<compile_context>
chip_gen: v5e
topology: v5e:2x2
jax: 0.10.0
libtpu: 0.0.40
codegen_flags: <defaults>
</compile_context>

<pallas_src>
import jax
import jax.numpy as jnp
from jax.experimental import pallas as pl
from jax.experimental.pallas import tpu as pltpu


def _round_up(x, m):
    return ((x + m - 1) // m) * m


def _vmem_capacity_bytes():
    try:
        return int(pltpu.get_tpu_info().vmem_capacity_bytes)
    except Exception:
        return 128 << 20  # v5e/v6e default


# --------------------------------------------------------------------------- #
# Kernel
# --------------------------------------------------------------------------- #
def _nb_ae_kernel(x_ref, bt_ref,
                  w1a_ref, w1b_ref, b1_ref,
                  w2z_ref, b2z_ref, pbt_ref,
                  w3z_ref, b3_ref,
                  w4_ref, b4_ref,
                  wl_ref,
                  rate_ref, logi_ref, z_ref):
    x = x_ref[...]              # (TB, input_dim)
    bt = bt_ref[...]            # (TB, n_batch)
    cdt = w1a_ref.dtype         # matmul operand dtype (f32 or bf16); f32 accumulation

    # layer1: Linear (eval-BN folded into weights/bias) + relu.
    # concat(x, bt) @ W1.T done as two MXU matmuls (W1 split row-wise).
    h1 = (jnp.dot(x.astype(cdt), w1a_ref[...], preferred_element_type=jnp.float32)
          + jnp.dot(bt.astype(cdt), w1b_ref[...], preferred_element_type=jnp.float32)
          + b1_ref[...])
    h1 = jnp.maximum(h1, 0.0)

    # layer2 emitted directly in the z = concat(z0, bt) layout (zdim wide):
    # padded W2 columns produce exact zeros (relu(0)=0) in the bt slots, then a
    # tiny placement matmul drops bt into those columns.
    z0 = jnp.dot(h1.astype(cdt), w2z_ref[...], preferred_element_type=jnp.float32) + b2z_ref[...]
    z0 = jnp.maximum(z0, 0.0)
    zfull = z0 + jnp.dot(bt.astype(cdt), pbt_ref[...], preferred_element_type=jnp.float32)
    z_ref[...] = zfull.astype(z_ref.dtype)

    # layer3: single matmul over the concat layout.
    x3 = jnp.dot(zfull.astype(cdt), w3z_ref[...], preferred_element_type=jnp.float32) + b3_ref[...]
    x3 = jnp.maximum(x3, 0.0)

    # layer4: exp head (rate_scaled), lane-padded output (lane-dense store).
    rate_ref[...] = jnp.exp(
        jnp.dot(x3.astype(cdt), w4_ref[...], preferred_element_type=jnp.float32) + b4_ref[...])

    # logi = exp(F.linear(batch_tensor, layer_logi)) as a single MXU matmul.
    logi_ref[...] = jnp.exp(
        jnp.dot(bt.astype(cdt), wl_ref[...], preferred_element_type=jnp.float32))


# --------------------------------------------------------------------------- #
# One-time weight preparation (hoisted out of the per-call path)
# --------------------------------------------------------------------------- #
def prepare_params(params, *, eps=1e-5, compute_dtype=jnp.float32):
    """Fold eval-mode BN into the Linears, transpose to (in, out), re-layout for
    the fused kernel, lane-pad the wide head outputs, optionally cast matmul
    weights to bf16 (biases stay f32). Call once and reuse across forwards."""
    hidden = params["w1"].shape[0]
    latent = params["w2"].shape[0]
    input_dim = params["w4"].shape[0]
    n_batch = params["w_logi"].shape[1]
    zdim = latent + n_batch

    def fold_bn(gamma, beta, mean, var):
        s = gamma / jnp.sqrt(var + eps)
        t = beta - mean * s
        return s, t

    s1, t1 = fold_bn(params["bn1_g"], params["bn1_b"], params["bn1_m"], params["bn1_v"])
    s2, t2 = fold_bn(params["bn2_g"], params["bn2_b"], params["bn2_m"], params["bn2_v"])

    # layer1: split W1 rows between x and batch_tensor (no HBM concat needed)
    w1_t = params["w1"].T * s1[None, :]                     # (input_dim + n_batch, H)
    w1a = w1_t[:input_dim, :]
    w1b = w1_t[input_dim:, :]
    b1 = (params["b1"] * s1 + t1)[None, :]

    # layer2 in the concat(z0, bt) layout: bt columns get zero weight/bias.
    w2_t = params["w2"].T * s2[None, :]                     # (H, latent)
    w2z = jnp.zeros((hidden, zdim), jnp.float32).at[:, :latent].set(w2_t)
    b2z = jnp.zeros((1, zdim), jnp.float32).at[0, :latent].set(params["b2"] * s2 + t2)
    idx = jnp.arange(n_batch)
    pbt = jnp.zeros((n_batch, zdim), jnp.float32).at[idx, latent + idx].set(1.0)

    # layer3 consumes the concat layout directly.
    w3z = params["w3"].T                                    # (zdim, H)
    b3 = params["b3"][None, :]

    # heads: lane-pad input_dim to a multiple of 128 for lane-dense stores.
    fpad = _round_up(max(input_dim, 128), 128)
    if fpad == input_dim:
        w4 = params["w4"].T
        b4 = params["b4"][None, :]
        wl = params["w_logi"].T
    else:
        w4 = jnp.zeros((hidden, fpad), jnp.float32).at[:, :input_dim].set(params["w4"].T)
        b4 = jnp.zeros((1, fpad), jnp.float32).at[0, :input_dim].set(params["b4"])
        wl = jnp.zeros((n_batch, fpad), jnp.float32).at[:, :input_dim].set(params["w_logi"].T)

    cdt = jnp.dtype(compute_dtype)
    cast = lambda w: w.astype(cdt)

    return dict(
        w1a=cast(w1a), w1b=cast(w1b), b1=b1,
        w2z=cast(w2z), b2z=b2z, pbt=cast(pbt),
        w3z=cast(w3z), b3=b3,
        w4=cast(w4), b4=b4, wl=cast(wl),
        dims=dict(input_dim=input_dim, hidden=hidden, latent=latent,
                  n_batch=n_batch, zdim=zdim, fpad=fpad),
    )


# --------------------------------------------------------------------------- #
# Forward wrapper
# --------------------------------------------------------------------------- #
def new_nb_ae_forward(x, batch_tensor, prepared, *, batch_tile=None):
    """Fused Pallas forward. x: (B, input_dim), batch_tensor: (B, n_batch)."""
    B, input_dim = x.shape
    d = prepared["dims"]
    n_batch, zdim, fpad, hidden = d["n_batch"], d["zdim"], d["fpad"], d["hidden"]
    assert input_dim == d["input_dim"]
    assert batch_tensor.shape == (B, n_batch)

    weight_keys = ("w1a", "w1b", "b1", "w2z", "b2z", "pbt", "w3z", "b3", "w4", "b4", "wl")
    weights = tuple(prepared[k] for k in weight_keys)
    weight_bytes = sum(int(a.size) * a.dtype.itemsize for a in weights)

    # ---- generation-aware tiling / VMEM budget ----
    vmem_cap = _vmem_capacity_bytes()
    small_vmem = vmem_cap <= (64 << 20)                  # v7x: 64 MiB per TensorCore
    budget = (48 << 20) if small_vmem else (100 << 20)   # v5e/v6e: 128 MiB physical

    if batch_tile is None:
        batch_tile = 256 if small_vmem else 1024
    tb = int(min(batch_tile, _round_up(B, 8)))
    if small_vmem and B > 8:
        # v7x has 2 TensorCores: make sure the 'parallel' batch axis has >= 2 steps.
        tb = int(min(tb, _round_up(-(-B // 2), 8)))

    def stream_bytes(t):
        # per-step streamed blocks (x, bt in; rate, logi, z out), double-buffered,
        # plus rough intermediate (h1/x3/z/head) VMEM.
        per = t * (input_dim + n_batch + 2 * fpad + zdim) * 4
        inter = t * (2 * hidden + zdim + fpad) * 4
        return 2 * per + inter

    while tb > 64 and weight_bytes + stream_bytes(tb) + (4 << 20) > budget:
        tb = max(8, _round_up(tb // 2, 8))

    vmem_limit = int(min(budget, max(32 << 20, weight_bytes + stream_bytes(tb) + (8 << 20))))
    grid = (pl.cdiv(B, tb),)

    def row_spec(f):
        return pl.BlockSpec((tb, f), lambda i: (i, 0))

    out_shapes = (jax.ShapeDtypeStruct((B, fpad), jnp.float32),   # rate (lane-padded)
                  jax.ShapeDtypeStruct((B, fpad), jnp.float32),   # logi (lane-padded)
                  jax.ShapeDtypeStruct((B, zdim), jnp.float32))   # z = concat(z0, bt)
    out_specs = (row_spec(fpad), row_spec(fpad), row_spec(zdim))

    flops = 2 * B * (input_dim * hidden + n_batch * hidden + hidden * zdim
                     + n_batch * zdim + zdim * hidden + hidden * fpad + n_batch * fpad)
    bytes_accessed = int(B * (input_dim + n_batch + 2 * fpad + zdim) * 4 + weight_bytes)
    cost = pl.CostEstimate(flops=int(flops), transcendentals=int(2 * B * fpad),
                           bytes_accessed=bytes_accessed)

    def build_call(single_buffer_weights):
        def weight_spec(shape):
            # Constant index_map: stays VMEM-resident across the whole grid.
            if single_buffer_weights:
                return pl.BlockSpec(shape, lambda i, _s=shape: (0,) * len(_s),
                                    pipeline_mode=pl.Buffered(1))
            return pl.BlockSpec(shape, lambda i, _s=shape: (0,) * len(_s))

        in_specs = [row_spec(input_dim), row_spec(n_batch)] + \
                   [weight_spec(w.shape) for w in weights]
        return pl.pallas_call(
            _nb_ae_kernel,
            out_shape=out_shapes,
            grid=grid,
            in_specs=in_specs,
            out_specs=out_specs,
            compiler_params=pltpu.CompilerParams(
                dimension_semantics=("parallel",),
                vmem_limit_bytes=vmem_limit),
            cost_estimate=cost,
        )

    try:
        rate_p, logi_p, z = build_call(True)(x, batch_tensor, *weights)
    except Exception:
        # Fallback: default double-buffered weights (identical semantics).
        rate_p, logi_p, z = build_call(False)(x, batch_tensor, *weights)

    # Slice the lane padding off only when padding was actually added.
    rate = rate_p if fpad == input_dim else rate_p[:, :input_dim]
    logi = logi_p if fpad == input_dim else logi_p[:, :input_dim]
    # PyTorch module returns (rate_scaled, logi.exp(), None, z)
    return rate, logi, None, z


# --------------------------------------------------------------------------- #
# Pure-JAX reference + test harness
# --------------------------------------------------------------------------- #
def _reference_forward(x, batch_tensor, params):
    """Pure-JAX reference mirroring the PyTorch eval-mode forward."""
    eps = 1e-5
    xcat = jnp.concatenate([x, batch_tensor], axis=-1)

    def bn(h, g, b, m, v):
        return (h - m) / jnp.sqrt(v + eps) * g + b

    h1 = jax.nn.relu(bn(xcat @ params["w1"].T + params["b1"],
                        params["bn1_g"], params["bn1_b"], params["bn1_m"], params["bn1_v"]))
    z0 = jax.nn.relu(bn(h1 @ params["w2"].T + params["b2"],
                        params["bn2_g"], params["bn2_b"], params["bn2_m"], params["bn2_v"]))
    z = jnp.concatenate([z0, batch_tensor], axis=-1)
    x3 = jax.nn.relu(z @ params["w3"].T + params["b3"])
    rate = jnp.exp(x3 @ params["w4"].T + params["b4"])
    logi = jnp.exp(batch_tensor @ params["w_logi"].T)
    return rate, logi, None, z


def _make_params(key, input_dim, hidden_dim, latent_dim, n_batch):
    din_all = input_dim + n_batch
    lat_all = latent_dim + n_batch
    ks = jax.random.split(key, 13)

    def lin(k, out_f, in_f):
        kw, kb = jax.random.split(k)
        bound = 1.0 / float(in_f) ** 0.5
        w = jax.random.uniform(kw, (out_f, in_f), jnp.float32, -bound, bound)
        b = jax.random.uniform(kb, (out_f,), jnp.float32, -bound, bound)
        return w, b

    w1, b1 = lin(ks[0], hidden_dim, din_all)
    w2, b2 = lin(ks[1], latent_dim, hidden_dim)
    w3, b3 = lin(ks[2], hidden_dim, lat_all)
    w4, b4 = lin(ks[3], input_dim, hidden_dim)
    w_logi = jax.random.normal(ks[4], (input_dim, n_batch), jnp.float32)

    return dict(
        w1=w1, b1=b1, w2=w2, b2=b2, w3=w3, b3=b3, w4=w4, b4=b4, w_logi=w_logi,
        bn1_g=1.0 + 0.1 * jax.random.normal(ks[5], (hidden_dim,), jnp.float32),
        bn1_b=0.1 * jax.random.normal(ks[6], (hidden_dim,), jnp.float32),
        bn1_m=0.05 * jax.random.normal(ks[7], (hidden_dim,), jnp.float32),
        bn1_v=jnp.abs(1.0 + 0.1 * jax.random.normal(ks[8], (hidden_dim,), jnp.float32)),
        bn2_g=1.0 + 0.1 * jax.random.normal(ks[9], (latent_dim,), jnp.float32),
        bn2_b=0.1 * jax.random.normal(ks[10], (latent_dim,), jnp.float32),
        bn2_m=0.05 * jax.random.normal(ks[11], (latent_dim,), jnp.float32),
        bn2_v=jnp.abs(1.0 + 0.1 * jax.random.normal(ks[12], (latent_dim,), jnp.float32)),
    )


if __name__ == "__main__":
    # small shapes; batch_tile=8 so the grid has >1 step and exercises the pipeline
    B, input_dim, hidden_dim, latent_dim, n_batch = 16, 32, 64, 16, 4

    key = jax.random.PRNGKey(0)
    k_x, k_bt, k_p = jax.random.split(key, 3)
    x = jax.random.normal(k_x, (B, input_dim), jnp.float32)
    batch_ids = jax.random.randint(k_bt, (B,), 0, n_batch)
    batch_tensor = jax.nn.one_hot(batch_ids, n_batch, dtype=jnp.float32)

    params = _make_params(k_p, input_dim, hidden_dim, latent_dim, n_batch)

    # One-time weight preparation (hoisted out of the per-call path).
    prepared = prepare_params(params)  # compute_dtype=jnp.bfloat16 for the fast path

    rate, logi, none_out, z = new_nb_ae_forward(x, batch_tensor, prepared, batch_tile=8)
    jax.block_until_ready((rate, logi, z))
    assert none_out is None

    r_rate, r_logi, _, r_z = _reference_forward(x, batch_tensor, params)
    for o, r in zip((rate, logi, z), (r_rate, r_logi, r_z)):
        assert o.shape == r.shape and o.dtype == r.dtype
        assert jnp.allclose(o, r, atol=1e-4, rtol=1e-4), "mismatch vs reference"

    print("KERNEL_OK")
</pallas_src>

<mosaic_0001>
module attributes {stable_mosaic.version = 11 : i64} {
  func.func @_nb_ae_kernel(%arg0: i32, %arg1: memref<8x32xf32, #tpu.memory_space<vmem>>, %arg2: memref<8x4xf32, #tpu.memory_space<vmem>>, %arg3: memref<32x64xf32, #tpu.memory_space<vmem>>, %arg4: memref<4x64xf32, #tpu.memory_space<vmem>>, %arg5: memref<1x64xf32, #tpu.memory_space<vmem>>, %arg6: memref<64x20xf32, #tpu.memory_space<vmem>>, %arg7: memref<1x20xf32, #tpu.memory_space<vmem>>, %arg8: memref<4x20xf32, #tpu.memory_space<vmem>>, %arg9: memref<20x64xf32, #tpu.memory_space<vmem>>, %arg10: memref<1x64xf32, #tpu.memory_space<vmem>>, %arg11: memref<64x128xf32, #tpu.memory_space<vmem>>, %arg12: memref<1x128xf32, #tpu.memory_space<vmem>>, %arg13: memref<4x128xf32, #tpu.memory_space<vmem>>, %arg14: memref<8x128xf32, #tpu.memory_space<vmem>>, %arg15: memref<8x128xf32, #tpu.memory_space<vmem>>, %arg16: memref<8x20xf32, #tpu.memory_space<vmem>>) attributes {dimension_semantics = [#tpu.dimension_semantics<parallel>], iteration_bounds = array<i64: 2>, scalar_prefetch = 0 : i64, scratch_operands = 0 : i64, tpu.core_type = #tpu.core_type<tc>, window_params = [{transform_indices = @transform_0, window_bounds = array<i64: 8, 32>}, {transform_indices = @transform_1, window_bounds = array<i64: 8, 4>}, {pipeline_mode = #tpu.pipeline_mode<synchronous>, transform_indices = @transform_2, window_bounds = array<i64: 32, 64>}, {pipeline_mode = #tpu.pipeline_mode<synchronous>, transform_indices = @transform_3, window_bounds = array<i64: 4, 64>}, {pipeline_mode = #tpu.pipeline_mode<synchronous>, transform_indices = @transform_4, window_bounds = array<i64: 1, 64>}, {pipeline_mode = #tpu.pipeline_mode<synchronous>, transform_indices = @transform_5, window_bounds = array<i64: 64, 20>}, {pipeline_mode = #tpu.pipeline_mode<synchronous>, transform_indices = @transform_6, window_bounds = array<i64: 1, 20>}, {pipeline_mode = #tpu.pipeline_mode<synchronous>, transform_indices = @transform_7, window_bounds = array<i64: 4, 20>}, {pipeline_mode = #tpu.pipeline_mode<synchronous>, transform_indices = @transform_8, window_bounds = array<i64: 20, 64>}, {pipeline_mode = #tpu.pipeline_mode<synchronous>, transform_indices = @transform_9, window_bounds = array<i64: 1, 64>}, {pipeline_mode = #tpu.pipeline_mode<synchronous>, transform_indices = @transform_10, window_bounds = array<i64: 64, 128>}, {pipeline_mode = #tpu.pipeline_mode<synchronous>, transform_indices = @transform_11, window_bounds = array<i64: 1, 128>}, {pipeline_mode = #tpu.pipeline_mode<synchronous>, transform_indices = @transform_12, window_bounds = array<i64: 4, 128>}, {transform_indices = @transform_13, window_bounds = array<i64: 8, 128>}, {transform_indices = @transform_14, window_bounds = array<i64: 8, 128>}, {transform_indices = @transform_15, window_bounds = array<i64: 8, 20>}]} {
    %c0 = arith.constant 0 : index
    %c0_0 = arith.constant 0 : index
    %0 = vector.load %arg1[%c0, %c0_0] : memref<8x32xf32, #tpu.memory_space<vmem>>, vector<8x32xf32>
    %c0_1 = arith.constant 0 : index
    %c0_2 = arith.constant 0 : index
    %1 = vector.load %arg2[%c0_1, %c0_2] : memref<8x4xf32, #tpu.memory_space<vmem>>, vector<8x4xf32>
    %c0_3 = arith.constant 0 : index
    %c0_4 = arith.constant 0 : index
    %2 = vector.load %arg3[%c0_3, %c0_4] : memref<32x64xf32, #tpu.memory_space<vmem>>, vector<32x64xf32>
    %cst = arith.constant dense<0.000000e+00> : vector<8x64xf32>
    %3 = tpu.matmul %0, %2, %cst {dimension_numbers = #tpu.dot_dimension_numbers<[1], [0], [0], [1], [0, 0, 1, 1], [], []>} : vector<8x32xf32>, vector<32x64xf32>, vector<8x64xf32> -> vector<8x64xf32>
    %c0_5 = arith.constant 0 : index
    %c0_6 = arith.constant 0 : index
    %4 = vector.load %arg4[%c0_5, %c0_6] : memref<4x64xf32, #tpu.memory_space<vmem>>, vector<4x64xf32>
    %cst_7 = arith.constant dense<0.000000e+00> : vector<8x64xf32>
    %5 = tpu.matmul %1, %4, %cst_7 {dimension_numbers = #tpu.dot_dimension_numbers<[1], [0], [0], [1], [0, 0, 1, 1], [], []>} : vector<8x4xf32>, vector<4x64xf32>, vector<8x64xf32> -> vector<8x64xf32>
    %6 = arith.addf %3, %5 : vector<8x64xf32>
    %c0_8 = arith.constant 0 : index
    %c0_9 = arith.constant 0 : index
    %7 = vector.load %arg5[%c0_8, %c0_9] : memref<1x64xf32, #tpu.memory_space<vmem>>, vector<1x64xf32>
    %8 = vector.broadcast %7 : vector<1x64xf32> to vector<8x64xf32>
    %9 = arith.addf %6, %8 : vector<8x64xf32>
    %cst_10 = arith.constant 0.000000e+00 : f32
    %10 = vector.broadcast %cst_10 : f32 to vector<8x64xf32>
    %11 = arith.maximumf %9, %10 : vector<8x64xf32>
    %c0_11 = arith.constant 0 : index
    %c0_12 = arith.constant 0 : index
    %12 = vector.load %arg6[%c0_11, %c0_12] : memref<64x20xf32, #tpu.memory_space<vmem>>, vector<64x20xf32>
    %cst_13 = arith.constant dense<0.000000e+00> : vector<8x20xf32>
    %13 = tpu.matmul %11, %12, %cst_13 {dimension_numbers = #tpu.dot_dimension_numbers<[1], [0], [0], [1], [0, 0, 1, 1], [], []>} : vector<8x64xf32>, vector<64x20xf32>, vector<8x20xf32> -> vector<8x20xf32>
    %c0_14 = arith.constant 0 : index
    %c0_15 = arith.constant 0 : index
    %14 = vector.load %arg7[%c0_14, %c0_15] : memref<1x20xf32, #tpu.memory_space<vmem>>, vector<1x20xf32>
    %15 = vector.broadcast %14 : vector<1x20xf32> to vector<8x20xf32>
    %16 = arith.addf %13, %15 : vector<8x20xf32>
    %cst_16 = arith.constant 0.000000e+00 : f32
    %17 = vector.broadcast %cst_16 : f32 to vector<8x20xf32>
    %18 = arith.maximumf %16, %17 : vector<8x20xf32>
    %c0_17 = arith.constant 0 : index
    %c0_18 = arith.constant 0 : index
    %19 = vector.load %arg8[%c0_17, %c0_18] : memref<4x20xf32, #tpu.memory_space<vmem>>, vector<4x20xf32>
    %cst_19 = arith.constant dense<0.000000e+00> : vector<8x20xf32>
    %20 = tpu.matmul %1, %19, %cst_19 {dimension_numbers = #tpu.dot_dimension_numbers<[1], [0], [0], [1], [0, 0, 1, 1], [], []>} : vector<8x4xf32>, vector<4x20xf32>, vector<8x20xf32> -> vector<8x20xf32>
    %21 = arith.addf %18, %20 : vector<8x20xf32>
    %c0_20 = arith.constant 0 : index
    %c0_21 = arith.constant 0 : index
    %22 = vector.load %arg16[%c0_20, %c0_21] : memref<8x20xf32, #tpu.memory_space<vmem>>, vector<8x20xf32>
    tpu.vector_store %arg16[%c0_20, %c0_21], %21 {strides = array<i32>} : memref<8x20xf32, #tpu.memory_space<vmem>>, vector<8x20xf32>,
    %c0_22 = arith.constant 0 : index
    %c0_23 = arith.constant 0 : index
    %23 = vector.load %arg9[%c0_22, %c0_23] : memref<20x64xf32, #tpu.memory_space<vmem>>, vector<20x64xf32>
    %cst_24 = arith.constant dense<0.000000e+00> : vector<8x64xf32>
    %24 = tpu.matmul %21, %23, %cst_24 {dimension_numbers = #tpu.dot_dimension_numbers<[1], [0], [0], [1], [0, 0, 1, 1], [], []>} : vector<8x20xf32>, vector<20x64xf32>, vector<8x64xf32> -> vector<8x64xf32>
    %c0_25 = arith.constant 0 : index
    %c0_26 = arith.constant 0 : index
    %25 = vector.load %arg10[%c0_25, %c0_26] : memref<1x64xf32, #tpu.memory_space<vmem>>, vector<1x64xf32>
    %26 = vector.broadcast %25 : vector<1x64xf32> to vector<8x64xf32>
    %27 = arith.addf %24, %26 : vector<8x64xf32>
    %cst_27 = arith.constant 0.000000e+00 : f32
    %28 = vector.broadcast %cst_27 : f32 to vector<8x64xf32>
    %29 = arith.maximumf %27, %28 : vector<8x64xf32>
    %c0_28 = arith.constant 0 : index
    %c0_29 = arith.constant 0 : index
    %30 = vector.load %arg11[%c0_28, %c0_29] : memref<64x128xf32, #tpu.memory_space<vmem>>, vector<64x128xf32>
    %cst_30 = arith.constant dense<0.000000e+00> : vector<8x128xf32>
    %31 = tpu.matmul %29, %30, %cst_30 {dimension_numbers = #tpu.dot_dimension_numbers<[1], [0], [0], [1], [0, 0, 1, 1], [], []>} : vector<8x64xf32>, vector<64x128xf32>, vector<8x128xf32> -> vector<8x128xf32>
    %c0_31 = arith.constant 0 : index
    %c0_32 = arith.constant 0 : index
    %32 = vector.load %arg12[%c0_31, %c0_32] : memref<1x128xf32, #tpu.memory_space<vmem>>, vector<1x128xf32>
    %33 = vector.broadcast %32 : vector<1x128xf32> to vector<8x128xf32>
    %34 = arith.addf %31, %33 : vector<8x128xf32>
    %35 = math.exp %34 : vector<8x128xf32>
    %c0_33 = arith.constant 0 : index
    %c0_34 = arith.constant 0 : index
    %36 = vector.load %arg14[%c0_33, %c0_34] : memref<8x128xf32, #tpu.memory_space<vmem>>, vector<8x128xf32>
    tpu.vector_store %arg14[%c0_33, %c0_34], %35 {strides = array<i32>} : memref<8x128xf32, #tpu.memory_space<vmem>>, vector<8x128xf32>,
    %c0_35 = arith.constant 0 : index
    %c0_36 = arith.constant 0 : index
    %37 = vector.load %arg13[%c0_35, %c0_36] : memref<4x128xf32, #tpu.memory_space<vmem>>, vector<4x128xf32>
    %cst_37 = arith.constant dense<0.000000e+00> : vector<8x128xf32>
    %38 = tpu.matmul %1, %37, %cst_37 {dimension_numbers = #tpu.dot_dimension_numbers<[1], [0], [0], [1], [0, 0, 1, 1], [], []>} : vector<8x4xf32>, vector<4x128xf32>, vector<8x128xf32> -> vector<8x128xf32>
    %39 = math.exp %38 : vector<8x128xf32>
    %c0_38 = arith.constant 0 : index
    %c0_39 = arith.constant 0 : index
    %40 = vector.load %arg15[%c0_38, %c0_39] : memref<8x128xf32, #tpu.memory_space<vmem>>, vector<8x128xf32>
    tpu.vector_store %arg15[%c0_38, %c0_39], %39 {strides = array<i32>} : memref<8x128xf32, #tpu.memory_space<vmem>>, vector<8x128xf32>,
    return
  }
  func.func @transform_0(%arg0: i32) -> (i32, i32) {
    %c0_i32 = arith.constant 0 : i32
    %c0_i32_0 = arith.constant 0 : i32
    return %arg0, %c0_i32 : i32, i32
  }
  func.func @transform_1(%arg0: i32) -> (i32, i32) {
    %c0_i32 = arith.constant 0 : i32
    %c0_i32_0 = arith.constant 0 : i32
    return %arg0, %c0_i32 : i32, i32
  }
  func.func @transform_2(%arg0: i32) -> (i32, i32) {
    %c0_i32 = arith.constant 0 : i32
    %c0_i32_0 = arith.constant 0 : i32
    %c0_i32_1 = arith.constant 0 : i32
    return %c0_i32, %c0_i32_0 : i32, i32
  }
  func.func @transform_3(%arg0: i32) -> (i32, i32) {
    %c0_i32 = arith.constant 0 : i32
    %c0_i32_0 = arith.constant 0 : i32
    %c0_i32_1 = arith.constant 0 : i32
    return %c0_i32, %c0_i32_0 : i32, i32
  }
  func.func @transform_4(%arg0: i32) -> (i32, i32) {
    %c0_i32 = arith.constant 0 : i32
    %c0_i32_0 = arith.constant 0 : i32
    %c0_i32_1 = arith.constant 0 : i32
    return %c0_i32, %c0_i32_0 : i32, i32
  }
  func.func @transform_5(%arg0: i32) -> (i32, i32) {
    %c0_i32 = arith.constant 0 : i32
    %c0_i32_0 = arith.constant 0 : i32
    %c0_i32_1 = arith.constant 0 : i32
    return %c0_i32, %c0_i32_0 : i32, i32
  }
  func.func @transform_6(%arg0: i32) -> (i32, i32) {
    %c0_i32 = arith.constant 0 : i32
    %c0_i32_0 = arith.constant 0 : i32
    %c0_i32_1 = arith.constant 0 : i32
    return %c0_i32, %c0_i32_0 : i32, i32
  }
  func.func @transform_7(%arg0: i32) -> (i32, i32) {
    %c0_i32 = arith.constant 0 : i32
    %c0_i32_0 = arith.constant 0 : i32
    %c0_i32_1 = arith.constant 0 : i32
    return %c0_i32, %c0_i32_0 : i32, i32
  }
  func.func @transform_8(%arg0: i32) -> (i32, i32) {
    %c0_i32 = arith.constant 0 : i32
    %c0_i32_0 = arith.constant 0 : i32
    %c0_i32_1 = arith.constant 0 : i32
    return %c0_i32, %c0_i32_0 : i32, i32
  }
  func.func @transform_9(%arg0: i32) -> (i32, i32) {
    %c0_i32 = arith.constant 0 : i32
    %c0_i32_0 = arith.constant 0 : i32
    %c0_i32_1 = arith.constant 0 : i32
    return %c0_i32, %c0_i32_0 : i32, i32
  }
  func.func @transform_10(%arg0: i32) -> (i32, i32) {
    %c0_i32 = arith.constant 0 : i32
    %c0_i32_0 = arith.constant 0 : i32
    %c0_i32_1 = arith.constant 0 : i32
    return %c0_i32, %c0_i32_0 : i32, i32
  }
  func.func @transform_11(%arg0: i32) -> (i32, i32) {
    %c0_i32 = arith.constant 0 : i32
    %c0_i32_0 = arith.constant 0 : i32
    %c0_i32_1 = arith.constant 0 : i32
    return %c0_i32, %c0_i32_0 : i32, i32
  }
  func.func @transform_12(%arg0: i32) -> (i32, i32) {
    %c0_i32 = arith.constant 0 : i32
    %c0_i32_0 = arith.constant 0 : i32
    %c0_i32_1 = arith.constant 0 : i32
    return %c0_i32, %c0_i32_0 : i32, i32
  }
  func.func @transform_13(%arg0: i32) -> (i32, i32) {
    %c0_i32 = arith.constant 0 : i32
    %c0_i32_0 = arith.constant 0 : i32
    return %arg0, %c0_i32 : i32, i32
  }
  func.func @transform_14(%arg0: i32) -> (i32, i32) {
    %c0_i32 = arith.constant 0 : i32
    %c0_i32_0 = arith.constant 0 : i32
    return %arg0, %c0_i32 : i32, i32
  }
  func.func @transform_15(%arg0: i32) -> (i32, i32) {
    %c0_i32 = arith.constant 0 : i32
    %c0_i32_0 = arith.constant 0 : i32
    return %arg0, %c0_i32 : i32, i32
  }
}

module attributes {stable_mosaic.version = 11 : i64} {
  func.func @_nb_ae_kernel(%arg0: i32, %arg1: memref<8x32xf32, #tpu.memory_space<vmem>>, %arg2: memref<8x4xf32, #tpu.memory_space<vmem>>, %arg3: memref<32x64xf32, #tpu.memory_space<vmem>>, %arg4: memref<4x64xf32, #tpu.memory_space<vmem>>, %arg5: memref<1x64xf32, #tpu.memory_space<vmem>>, %arg6: memref<64x20xf32, #tpu.memory_space<vmem>>, %arg7: memref<1x20xf32, #tpu.memory_space<vmem>>, %arg8: memref<4x20xf32, #tpu.memory_space<vmem>>, %arg9: memref<20x64xf32, #tpu.memory_space<vmem>>, %arg10: memref<1x64xf32, #tpu.memory_space<vmem>>, %arg11: memref<64x128xf32, #tpu.memory_space<vmem>>, %arg12: memref<1x128xf32, #tpu.memory_space<vmem>>, %arg13: memref<4x128xf32, #tpu.memory_space<vmem>>, %arg14: memref<8x128xf32, #tpu.memory_space<vmem>>, %arg15: memref<8x128xf32, #tpu.memory_space<vmem>>, %arg16: memref<8x20xf32, #tpu.memory_space<vmem>>) attributes {dimension_semantics = [#tpu.dimension_semantics<parallel>], iteration_bounds = array<i64: 2>, scalar_prefetch = 0 : i64, scratch_operands = 0 : i64, tpu.core_type = #tpu.core_type<tc>, window_params = [{transform_indices = @transform_0, window_bounds = array<i64: 8, 32>}, {transform_indices = @transform_1, window_bounds = array<i64: 8, 4>}, {pipeline_mode = #tpu.pipeline_mode<synchronous>, transform_indices = @transform_2, window_bounds = array<i64: 32, 64>}, {pipeline_mode = #tpu.pipeline_mode<synchronous>, transform_indices = @transform_3, window_bounds = array<i64: 4, 64>}, {pipeline_mode = #tpu.pipeline_mode<synchronous>, transform_indices = @transform_4, window_bounds = array<i64: 1, 64>}, {pipeline_mode = #tpu.pipeline_mode<synchronous>, transform_indices = @transform_5, window_bounds = array<i64: 64, 20>}, {pipeline_mode = #tpu.pipeline_mode<synchronous>, transform_indices = @transform_6, window_bounds = array<i64: 1, 20>}, {pipeline_mode = #tpu.pipeline_mode<synchronous>, transform_indices = @transform_7, window_bounds = array<i64: 4, 20>}, {pipeline_mode = #tpu.pipeline_mode<synchronous>, transform_indices = @transform_8, window_bounds = array<i64: 20, 64>}, {pipeline_mode = #tpu.pipeline_mode<synchronous>, transform_indices = @transform_9, window_bounds = array<i64: 1, 64>}, {pipeline_mode = #tpu.pipeline_mode<synchronous>, transform_indices = @transform_10, window_bounds = array<i64: 64, 128>}, {pipeline_mode = #tpu.pipeline_mode<synchronous>, transform_indices = @transform_11, window_bounds = array<i64: 1, 128>}, {pipeline_mode = #tpu.pipeline_mode<synchronous>, transform_indices = @transform_12, window_bounds = array<i64: 4, 128>}, {transform_indices = @transform_13, window_bounds = array<i64: 8, 128>}, {transform_indices = @transform_14, window_bounds = array<i64: 8, 128>}, {transform_indices = @transform_15, window_bounds = array<i64: 8, 20>}]} {
    %c0 = arith.constant 0 : index
    %c0_0 = arith.constant 0 : index
    %0 = vector.load %arg1[%c0, %c0_0] : memref<8x32xf32, #tpu.memory_space<vmem>>, vector<8x32xf32>
    %c0_1 = arith.constant 0 : index
    %c0_2 = arith.constant 0 : index
    %1 = vector.load %arg2[%c0_1, %c0_2] : memref<8x4xf32, #tpu.memory_space<vmem>>, vector<8x4xf32>
    %c0_3 = arith.constant 0 : index
    %c0_4 = arith.constant 0 : index
    %2 = vector.load %arg3[%c0_3, %c0_4] : memref<32x64xf32, #tpu.memory_space<vmem>>, vector<32x64xf32>
    %cst = arith.constant dense<0.000000e+00> : vector<8x64xf32>
    %3 = tpu.matmul %0, %2, %cst {dimension_numbers = #tpu.dot_dimension_numbers<[1], [0], [0], [1], [0, 0, 1, 1], [], []>} : vector<8x32xf32>, vector<32x64xf32>, vector<8x64xf32> -> vector<8x64xf32>
    %c0_5 = arith.constant 0 : index
    %c0_6 = arith.constant 0 : index
    %4 = vector.load %arg4[%c0_5, %c0_6] : memref<4x64xf32, #tpu.memory_space<vmem>>, vector<4x64xf32>
    %cst_7 = arith.constant dense<0.000000e+00> : vector<8x64xf32>
    %5 = tpu.matmul %1, %4, %cst_7 {dimension_numbers = #tpu.dot_dimension_numbers<[1], [0], [0], [1], [0, 0, 1, 1], [], []>} : vector<8x4xf32>, vector<4x64xf32>, vector<8x64xf32> -> vector<8x64xf32>
    %6 = arith.addf %3, %5 : vector<8x64xf32>
    %c0_8 = arith.constant 0 : index
    %c0_9 = arith.constant 0 : index
    %7 = vector.load %arg5[%c0_8, %c0_9] : memref<1x64xf32, #tpu.memory_space<vmem>>, vector<1x64xf32>
    %8 = vector.broadcast %7 : vector<1x64xf32> to vector<8x64xf32>
    %9 = arith.addf %6, %8 : vector<8x64xf32>
    %cst_10 = arith.constant 0.000000e+00 : f32
    %10 = vector.broadcast %cst_10 : f32 to vector<8x64xf32>
    %11 = arith.maximumf %9, %10 : vector<8x64xf32>
    %c0_11 = arith.constant 0 : index
    %c0_12 = arith.constant 0 : index
    %12 = vector.load %arg6[%c0_11, %c0_12] : memref<64x20xf32, #tpu.memory_space<vmem>>, vector<64x20xf32>
    %cst_13 = arith.constant dense<0.000000e+00> : vector<8x20xf32>
    %13 = tpu.matmul %11, %12, %cst_13 {dimension_numbers = #tpu.dot_dimension_numbers<[1], [0], [0], [1], [0, 0, 1, 1], [], []>} : vector<8x64xf32>, vector<64x20xf32>, vector<8x20xf32> -> vector<8x20xf32>
    %c0_14 = arith.constant 0 : index
    %c0_15 = arith.constant 0 : index
    %14 = vector.load %arg7[%c0_14, %c0_15] : memref<1x20xf32, #tpu.memory_space<vmem>>, vector<1x20xf32>
    %15 = vector.broadcast %14 : vector<1x20xf32> to vector<8x20xf32>
    %16 = arith.addf %13, %15 : vector<8x20xf32>
    %cst_16 = arith.constant 0.000000e+00 : f32
    %17 = vector.broadcast %cst_16 : f32 to vector<8x20xf32>
    %18 = arith.maximumf %16, %17 : vector<8x20xf32>
    %c0_17 = arith.constant 0 : index
    %c0_18 = arith.constant 0 : index
    %19 = vector.load %arg8[%c0_17, %c0_18] : memref<4x20xf32, #tpu.memory_space<vmem>>, vector<4x20xf32>
    %cst_19 = arith.constant dense<0.000000e+00> : vector<8x20xf32>
    %20 = tpu.matmul %1, %19, %cst_19 {dimension_numbers = #tpu.dot_dimension_numbers<[1], [0], [0], [1], [0, 0, 1, 1], [], []>} : vector<8x4xf32>, vector<4x20xf32>, vector<8x20xf32> -> vector<8x20xf32>
    %21 = arith.addf %18, %20 : vector<8x20xf32>
    %c0_20 = arith.constant 0 : index
    %c0_21 = arith.constant 0 : index
    %22 = vector.load %arg16[%c0_20, %c0_21] : memref<8x20xf32, #tpu.memory_space<vmem>>, vector<8x20xf32>
    tpu.vector_store %arg16[%c0_20, %c0_21], %21 {strides = array<i32>} : memref<8x20xf32, #tpu.memory_space<vmem>>, vector<8x20xf32>,
    %c0_22 = arith.constant 0 : index
    %c0_23 = arith.constant 0 : index
    %23 = vector.load %arg9[%c0_22, %c0_23] : memref<20x64xf32, #tpu.memory_space<vmem>>, vector<20x64xf32>
    %cst_24 = arith.constant dense<0.000000e+00> : vector<8x64xf32>
    %24 = tpu.matmul %21, %23, %cst_24 {dimension_numbers = #tpu.dot_dimension_numbers<[1], [0], [0], [1], [0, 0, 1, 1], [], []>} : vector<8x20xf32>, vector<20x64xf32>, vector<8x64xf32> -> vector<8x64xf32>
    %c0_25 = arith.constant 0 : index
    %c0_26 = arith.constant 0 : index
    %25 = vector.load %arg10[%c0_25, %c0_26] : memref<1x64xf32, #tpu.memory_space<vmem>>, vector<1x64xf32>
    %26 = vector.broadcast %25 : vector<1x64xf32> to vector<8x64xf32>
    %27 = arith.addf %24, %26 : vector<8x64xf32>
    %cst_27 = arith.constant 0.000000e+00 : f32
    %28 = vector.broadcast %cst_27 : f32 to vector<8x64xf32>
    %29 = arith.maximumf %27, %28 : vector<8x64xf32>
    %c0_28 = arith.constant 0 : index
    %c0_29 = arith.constant 0 : index
    %30 = vector.load %arg11[%c0_28, %c0_29] : memref<64x128xf32, #tpu.memory_space<vmem>>, vector<64x128xf32>
    %cst_30 = arith.constant dense<0.000000e+00> : vector<8x128xf32>
    %31 = tpu.matmul %29, %30, %cst_30 {dimension_numbers = #tpu.dot_dimension_numbers<[1], [0], [0], [1], [0, 0, 1, 1], [], []>} : vector<8x64xf32>, vector<64x128xf32>, vector<8x128xf32> -> vector<8x128xf32>
    %c0_31 = arith.constant 0 : index
    %c0_32 = arith.constant 0 : index
    %32 = vector.load %arg12[%c0_31, %c0_32] : memref<1x128xf32, #tpu.memory_space<vmem>>, vector<1x128xf32>
    %33 = vector.broadcast %32 : vector<1x128xf32> to vector<8x128xf32>
    %34 = arith.addf %31, %33 : vector<8x128xf32>
    %35 = math.exp %34 : vector<8x128xf32>
    %c0_33 = arith.constant 0 : index
    %c0_34 = arith.constant 0 : index
    %36 = vector.load %arg14[%c0_33, %c0_34] : memref<8x128xf32, #tpu.memory_space<vmem>>, vector<8x128xf32>
    tpu.vector_store %arg14[%c0_33, %c0_34], %35 {strides = array<i32>} : memref<8x128xf32, #tpu.memory_space<vmem>>, vector<8x128xf32>,
    %c0_35 = arith.constant 0 : index
    %c0_36 = arith.constant 0 : index
    %37 = vector.load %arg13[%c0_35, %c0_36] : memref<4x128xf32, #tpu.memory_space<vmem>>, vector<4x128xf32>
    %cst_37 = arith.constant dense<0.000000e+00> : vector<8x128xf32>
    %38 = tpu.matmul %1, %37, %cst_37 {dimension_numbers = #tpu.dot_dimension_numbers<[1], [0], [0], [1], [0, 0, 1, 1], [], []>} : vector<8x4xf32>, vector<4x128xf32>, vector<8x128xf32> -> vector<8x128xf32>
    %39 = math.exp %38 : vector<8x128xf32>
    %c0_38 = arith.constant 0 : index
    %c0_39 = arith.constant 0 : index
    %40 = vector.load %arg15[%c0_38, %c0_39] : memref<8x128xf32, #tpu.memory_space<vmem>>, vector<8x128xf32>
    tpu.vector_store %arg15[%c0_38, %c0_39], %39 {strides = array<i32>} : memref<8x128xf32, #tpu.memory_space<vmem>>, vector<8x128xf32>,
    return
  }
  func.func @transform_0(%arg0: i32) -> (i32, i32) {
    %c0_i32 = arith.constant 0 : i32
    %c0_i32_0 = arith.constant 0 : i32
    return %arg0, %c0_i32 : i32, i32
  }
  func.func @transform_1(%arg0: i32) -> (i32, i32) {
    %c0_i32 = arith.constant 0 : i32
    %c0_i32_0 = arith.constant 0 : i32
    return %arg0, %c0_i32 : i32, i32
  }
  func.func @transform_2(%arg0: i32) -> (i32, i32) {
    %c0_i32 = arith.constant 0 : i32
    %c0_i32_0 = arith.constant 0 : i32
    %c0_i32_1 = arith.constant 0 : i32
    return %c0_i32, %c0_i32_0 : i32, i32
  }
  func.func @transform_3(%arg0: i32) -> (i32, i32) {
    %c0_i32 = arith.constant 0 : i32
    %c0_i32_0 = arith.constant 0 : i32
    %c0_i32_1 = arith.constant 0 : i32
    return %c0_i32, %c0_i32_0 : i32, i32
  }
  func.func @transform_4(%arg0: i32) -> (i32, i32) {
    %c0_i32 = arith.constant 0 : i32
    %c0_i32_0 = arith.constant 0 : i32
    %c0_i32_1 = arith.constant 0 : i32
    return %c0_i32, %c0_i32_0 : i32, i32
  }
  func.func @transform_5(%arg0: i32) -> (i32, i32) {
    %c0_i32 = arith.constant 0 : i32
    %c0_i32_0 = arith.constant 0 : i32
    %c0_i32_1 = arith.constant 0 : i32
    return %c0_i32, %c0_i32_0 : i32, i32
  }
  func.func @transform_6(%arg0: i32) -> (i32, i32) {
    %c0_i32 = arith.constant 0 : i32
    %c0_i32_0 = arith.constant 0 : i32
    %c0_i32_1 = arith.constant 0 : i32
    return %c0_i32, %c0_i32_0 : i32, i32
  }
  func.func @transform_7(%arg0: i32) -> (i32, i32) {
    %c0_i32 = arith.constant 0 : i32
    %c0_i32_0 = arith.constant 0 : i32
    %c0_i32_1 = arith.constant 0 : i32
    return %c0_i32, %c0_i32_0 : i32, i32
  }
  func.func @transform_8(%arg0: i32) -> (i32, i32) {
    %c0_i32 = arith.constant 0 : i32
    %c0_i32_0 = arith.constant 0 : i32
    %c0_i32_1 = arith.constant 0 : i32
    return %c0_i32, %c0_i32_0 : i32, i32
  }
  func.func @transform_9(%arg0: i32) -> (i32, i32) {
    %c0_i32 = arith.constant 0 : i32
    %c0_i32_0 = arith.constant 0 : i32
    %c0_i32_1 = arith.constant 0 : i32
    return %c0_i32, %c0_i32_0 : i32, i32
  }
  func.func @transform_10(%arg0: i32) -> (i32, i32) {
    %c0_i32 = arith.constant 0 : i32
    %c0_i32_0 = arith.constant 0 : i32
    %c0_i32_1 = arith.constant 0 : i32
    return %c0_i32, %c0_i32_0 : i32, i32
  }
  func.func @transform_11(%arg0: i32) -> (i32, i32) {
    %c0_i32 = arith.constant 0 : i32
    %c0_i32_0 = arith.constant 0 : i32
    %c0_i32_1 = arith.constant 0 : i32
    return %c0_i32, %c0_i32_0 : i32, i32
  }
  func.func @transform_12(%arg0: i32) -> (i32, i32) {
    %c0_i32 = arith.constant 0 : i32
    %c0_i32_0 = arith.constant 0 : i32
    %c0_i32_1 = arith.constant 0 : i32
    return %c0_i32, %c0_i32_0 : i32, i32
  }
  func.func @transform_13(%arg0: i32) -> (i32, i32) {
    %c0_i32 = arith.constant 0 : i32
    %c0_i32_0 = arith.constant 0 : i32
    return %arg0, %c0_i32 : i32, i32
  }
  func.func @transform_14(%arg0: i32) -> (i32, i32) {
    %c0_i32 = arith.constant 0 : i32
    %c0_i32_0 = arith.constant 0 : i32
    return %arg0, %c0_i32 : i32, i32
  }
  func.func @transform_15(%arg0: i32) -> (i32, i32) {
    %c0_i32 = arith.constant 0 : i32
    %c0_i32_0 = arith.constant 0 : i32
    return %arg0, %c0_i32 : i32, i32
  }
}

</mosaic_0001>

<bundles_post_ra>
// kernel: tpu_custom_call.1
= control target key start
LH: loop header
LB: loop body
LE: loop exit
PB: predicated region body
PF: predicated region fallthrough
CT: control target
= control target key end

     0   :  { %s1945_s0 = inlined_call_operand.vmem [shape: f32[16,32], index: 0, kind: input, shape index: {}]   ;;  %s1946_s1 = inlined_call_operand.vmem [shape: f32[16,4], index: 1, kind: input, shape index: {}]   ;;  %s1947_s2 = inlined_call_operand.vmem [shape: f32[32,64], index: 2, kind: input, shape index: {}]   ;;  %s1948_s3 = inlined_call_operand.vmem [shape: f32[4,64], index: 3, kind: input, shape index: {}]   ;;  %s1949_s4 = inlined_call_operand.vmem [shape: f32[1,64], index: 4, kind: input, shape index: {}]   ;;  %s1950_s5 = inlined_call_operand.vmem [shape: f32[64,20], index: 5, kind: input, shape index: {}]   ;;  %s1951_s6 = inlined_call_operand.hbm [shape: f32[1,20], index: 6, kind: input, shape index: {}]   ;;  %s1952_s7 = inlined_call_operand.hbm [shape: f32[4,20], index: 7, kind: input, shape index: {}]   ;;  %s1953_s8 = inlined_call_operand.hbm [shape: f32[20,64], index: 8, kind: input, shape index: {}]   ;;  %s1954_s9 = inlined_call_operand.hbm [shape: f32[1,64], index: 9, kind: input, shape index: {}]   ;;  %s1955_s10 = inlined_call_operand.vmem [shape: f32[64,128], index: 10, kind: input, shape index: {}]   ;;  %s1956_s11 = inlined_call_operand.hbm [shape: f32[1,128], index: 11, kind: input, shape index: {}]   ;;  %s1957_s12 = inlined_call_operand.hbm [shape: f32[4,128], index: 12, kind: input, shape index: {}]   ;;  %s1958_s13 = inlined_call_operand.hbm [shape: f32[16,128], index: 13, kind: output, shape index: {0}]   ;;  %s1959_s14 = inlined_call_operand.hbm [shape: f32[16,128], index: 14, kind: output, shape index: {1}]   ;;  %s1960_s15 = inlined_call_operand.hbm [shape: f32[16,20], index: 15, kind: output, shape index: {2}]  }
   0x1   :  { %1970 = sst [smem:[#allocation29_spill]] %s1951_s6 }
   0x2   :  { %1971 = sst [smem:[#allocation30_spill]] %s1952_s7 }
   0x3   :  { %1972 = sst [smem:[#allocation31_spill]] %s1954_s9 }
   0x4   :  { %1973 = sst [smem:[#allocation32_spill]] %s1958_s13 }
   0x5   :  { %21 = vsyncpa [#allocation3], 0 }
   0x6   :  { %22 = vsyncpa [#allocation6], 0 }
   0x7   :  { %23 = vsyncpa [#allocation9], 0 }
   0x8   :  { %24 = vsyncpa [#allocation12], 0 }
   0x9   :  { %25 = vsyncpa [#allocation4], 0 }
   0xa   :  { %27 = vsyncpa [#allocation4 + $0x1], 0 }
   0xb   :  { %28 = vsyncpa [#allocation15], 0 }
   0xc   :  { %30 = vsyncpa [#allocation15 + $0x1], 0  ;;  %s1659_s18 = smov 0   ;;  %s1661_s19 = smov 0  }
   0xd   :  { %s1663_s20 = smov 0   ;;  %s1665_s21 = smov 0  }
   0xe LB: > { %1974 = sst [smem:[#allocation23_spill]] %s1557_s18  ;;  %s1680_s22 = sadd.s32 4294967295, %s1569_s21   ;;  %s1569_s21 = sphi %s1665_s21, %s1992_s21   ;;  %s1565_s20 = sphi %s1663_s20, %s1994_s20   ;;  %s1561_s19 = sphi %s1661_s19, %s1996_s19   ;;  %s1557_s18 = sphi %s1659_s18, %s1995_s18  }
   0xf   : > { %1975 = sst [smem:[#allocation24_spill]] %s1565_s20  ;;  %s1961_s23 = sadd.s32 4294967294, %s1569_s21  }
  0x10   : > { %1976 = sst [smem:[#allocation25_spill]] %s1569_s21  ;;  %s1684_s24 = sadd.s32 1, %s1569_s21  }
  0x11   : > { %1977 = sst [smem:[#allocation26_spill]] %s1684_s24  ;;  %s326_s25 = sadd.s32 1, %s1565_s20 }
  0x12   : > { %s323_s26 = ssub.s32 %s1569_s21, %s1684_s24  ;;  %p336_p0 = scmp.ne.s32.totalorder %s1565_s20, %s1561_s19 }
  0x13   : > { %p324_p1 = scmp.eq.s32.totalorder %s323_s26, 0  ;;  %p337_p2 = scmp.eq.s32.totalorder %s1680_s22, 1 }
  0x14   : > { %p342_p3 = scmp.ne.s32.totalorder %s1561_s19, %s1557_s18  ;;  %p343_p4 = scmp.eq.s32.totalorder %s1961_s23, 1 }
  0x15   : > { %s1697_s27 = scalar_select %p324_p1, %s1565_s20, %s326_s25  }
  0x16   : > { %p1699_p5 = por %p337_p2, %p336_p0  ;;  %p1703_p6 = por %p343_p4, %p342_p3 }
  0x17   : > { %1978 = sst [smem:[#allocation27_spill]] %s1697_s27  ;;  %p1092_p7 = scmp.ge.s32.totalorder %s1569_s21, 1 }
  0x18   : > { %s1980_s29 = scalar_select %p1703_p6, 1, 0 }
  0x19   : > { %p402_p8 = scmp.lt.s32.totalorder %s1569_s21, 3  ;;  %p1190_p9 = scmp.eq.s32.totalorder %s1680_s22, 0 }
  0x1a   : > { %1981 = sst [smem:[#allocation28_spill]] %s1980_s29  ;;  %s1571_s26 = smov [#allocation5]  }
  0x1b   : > { %p1710_p10 = pnand %p1092_p7, %p402_p8  ;;  %s1983_s7 = sld [smem:[#allocation30_spill]] }
  0x1c   : > { %s440_s23 = sshll.u32 %s1571_s26, 4  ;;  %s1984_s9 = sld [smem:[#allocation31_spill]]  ;;  %s441_s23 = int_to_ptr.vmem [resolvable:$true] %s440_s23 }
  0x1d   : > { %p1161_p11 = pneg %p1710_p10  ;;  %s1986_s6 = sld [smem:[#allocation29_spill]] }
  0x1e   : > { %s1572_s18 = smov [#allocation8]   ;;  %s1573_s21 = smov [#allocation2]  }
  0x1f   : > { %p1724_p12 = pnand %p1190_p9, %p1161_p11  ;;  %s466_s26 = sshll.u32 %s1572_s18, 4  ;;  %s467_s26 = int_to_ptr.vmem [resolvable:$true] %s466_s26 }
  0x20   : > { %s428_s13 = sshll.u32 %s1573_s21, 4  ;;  %s1574_s16 = smov [#allocation7]   ;;  %s429_s13 = int_to_ptr.vmem [resolvable:$true] %s428_s13 }
  0x21   : > { %s438_s25 = sshll.u32 %s1983_s7, 4  ;;  %s451_s18 = sshll.u32 %s1574_s16, 4  ;;  %s439_s25 = int_to_ptr.hbm [resolvable:$true] %s438_s25  ;;  %s452_s18 = int_to_ptr.vmem [resolvable:$true] %s451_s18 }
  0x22   : > { %s464_s24 = sshll.u32 %s1984_s9, 4  ;;  %s449_s9 = sshll.u32 %s1953_s8, 4  ;;  %s465_s24 = int_to_ptr.hbm [resolvable:$true] %s464_s24  ;;  %s450_s9 = int_to_ptr.hbm [resolvable:$true] %s449_s9 }
  0x23   : > { %s426_s7 = sshll.u32 %s1986_s6, 4  ;;  %s1577_s20 = smov [#allocation10]   ;;  %s427_s7 = int_to_ptr.hbm [resolvable:$true] %s426_s7 }
  0x24   : > { %1167 = dma.hbm_to_vmem [thread:$0]  (!%p1724_p12), %s439_s25, 64, %s441_s23, [#allocation6]  }
  0x25   : > { %1173 = dma.hbm_to_vmem [thread:$0]  (!%p1724_p12), %s465_s24, 16, %s467_s26, [#allocation9]  }
  0x26   : > { %1164 = dma.hbm_to_vmem [thread:$0]  (!%p1724_p12), %s427_s7, 16, %s429_s13, [#allocation3]  }
  0x27   : > { %s1575_s23 = smov 128   ;;  %s1576_s25 = smov 8  }
  0x28   : > { %1170 = dma.hbm_to_vmem [thread:$0]  (!%p1724_p12), %s450_s9, 384, %s452_s18, [#allocation6], %s1575_s23, %s1575_s23, %s1576_s25  }
  0x29   : > { %s479_s26 = sshll.u32 %s1956_s11, 4  ;;  %s481_s21 = sshll.u32 %s1577_s20, 4  ;;  %s480_s26 = int_to_ptr.hbm [resolvable:$true] %s479_s26  ;;  %s482_s21 = int_to_ptr.vmem [resolvable:$true] %s481_s21 }
  0x2a   : > { %s491_s7 = sshll.u32 %s1957_s12, 4  ;;  %s1578_s13 = smov [#allocation11]   ;;  %s492_s7 = int_to_ptr.hbm [resolvable:$true] %s491_s7 }
  0x2b   : > { %1176 = dma.hbm_to_vmem [thread:$0]  (!%p1724_p12), %s480_s26, 16, %s482_s21, [#allocation9]  }
  0x2c   : > { %s493_s16 = sshll.u32 %s1578_s13, 4  ;;  %520 = sbr.rel (%p1710_p10) target bundleno = 610 (0x262), region = 72  ;;  %s494_s16 = int_to_ptr.vmem [resolvable:$true] %s493_s16 }
  0x2d   : > { %1179 = dma.hbm_to_vmem [thread:$0]  (!%p1724_p12), %s492_s7, 64, %s494_s16, [#allocation12]  }
  0x31   : > { %1532 = dma.done.wait (%p1190_p9), [#allocation3], 16  }
  0x32   : > { %1534 = vsyncadd (%p1190_p9), [#allocation3], 4294967280 }
  0x33   : > { %1536 = dma.done.wait (%p1190_p9), [#allocation6], 448  }
  0x34   : > { %1538 = vsyncadd (%p1190_p9), [#allocation6], 4294966848 }
  0x35   : > { %1540 = dma.done.wait (%p1190_p9), [#allocation9], 32  }
  0x36   : > { %1542 = vsyncadd (%p1190_p9), [#allocation9], 4294967264 }
  0x37   : > { %1544 = dma.done.wait (%p1190_p9), [#allocation12], 64  }
  0x38   : > { %1546 = vsyncadd (%p1190_p9), [#allocation12], 4294967232  ;;  %p607_p13 = scmp.lt.s32.totalorder %s1680_s22, 1  ;;  %vm626_vm0 = vcmask 1043456   ;;  %v620_v0 = vld [vmem:[%s1947_s2 + $0x18] sm:$0xff]  ;;  %v619_v1 = vld [vmem:[%s1947_s2 + $0x10] sm:$0xff] }
  0x39   : > { %vm622_vm1 = vcmask 31744   ;;  %666 = vmatpush.msra.mxu1 %v620_v0  ;;  %v621_v2 = vld [vmem:[%s1948_s3] sm:$0xf]  ;;  %v618_v4 = vld [vmem:[%s1947_s2 + $0x8] sm:$0xff]  ;;  %v687_v5 = vld [vmem:[%s1950_s5 + $0x38] sm:$0xff]  ;;  %vm650_vm2 = vcmask 261120  }
  0x3a   : > { %s608_s6 = scalar_select %p607_p13, %s1680_s22, 1  ;;  %1112 = vmatpush.msk.msra.mxu0 %vm626_vm0, %v621_v2  ;;  %v617_v6 = vld [vmem:[%s1947_s2] sm:$0xff]  ;;  %v686_v7 = vld [vmem:[%s1950_s5 + $0x30] sm:$0xff]  ;;  %704 = vmatpush.msra.mxu2 %v687_v5  ;;  %v685_v9 = vld [vmem:[%s1950_s5 + $0x28] sm:$0xff]  ;;  %vm692_vm3 = vcmask 523264   ;;  %vm742_vm4 = vcmask 162816  }
  0x3b   : > { %667 = vmatpush.msra.mxu1 %v619_v1  ;;  %v684_v10 = vld [vmem:[%s1950_s5 + $0x20] sm:$0xff]  ;;  %v683_v11 = vld [vmem:[%s1950_s5 + $0x18] sm:$0xff]  ;;  %v682_v12 = vld [vmem:[%s1950_s5 + $0x10] sm:$0xff]  ;;  %s590_s13 = sand.u32 1, %s1561_s19   ;;  %s1865_s24 = sshll.u32 %s1680_s22, 3 }
  0x3c   : > { %s1110_s9 = sshll.u32 %s608_s6, 3  ;;  %705 = vmatpush.msra.mxu2 %v686_v7  ;;  %v681_v13 = vld [vmem:[%s1950_s5 + $0x8] sm:$0xff]  ;;  %v680_v14 = vld [vmem:[%s1950_s5] sm:$0xff]  ;;  %v746_v16 = vld [vmem:[#allocation7 + $0x10] sm:$0xf]  ;;  %s878_s20 = scalar_lea.hbm %s1959_s14, %s1865_s24 }
  0x3d   : > { %s614_s18 = scalar_lea.vmem %s1946_s1, %s1110_s9  ;;  %s610_s16 = scalar_lea.vmem %s1945_s0, %s1110_s9  ;;  %668 = vmatpush.msra.mxu1 %v618_v4  ;;  %v717_v15 = vld [vmem:[#allocation5] sm:$0xf]  ;;  %1118 = vmatpush.msk.msrb.mxu0 %vm626_vm0, %v746_v16  ;;  %v1243_v18 = vld [vmem:[%s1949_s4] ss:$0 sm:$0xff]  ;;  %v745_v23 = vld [vmem:[#allocation7 + $0x8] sm:$0xff] }
  0x3e   : > { %v1784_v3 = vld [vmem:[%s614_s18] sm:$0xff]  ;;  %706 = vmatpush.msra.mxu2 %v685_v9  ;;  %1116 = vmatpush.msk.msra.mxu3 %vm626_vm0, %v717_v15  ;;  %v785_v25 = vld [vmem:[%s1955_s10 + $0x38] sm:$0xff]  ;;  %v784_v26 = vld [vmem:[%s1955_s10 + $0x30] sm:$0xff]  ;;  %s892_s7 = scalar_lea.hbm %s1960_s15, %s1865_s24  ;;  %s848_s29 = sand.u32 1, %s1680_s22  }
  0x3f   : > { %1113 = vmatmul.msk.f32.vlgmr.msra.gmra.mxu0 %vm622_vm1, %v1784_v3  ;;  %v615_v8 = vld [vmem:[%s610_s16] sm:$0xff]  ;;  %669 = vmatpush.msra.mxu1 %v617_v6  ;;  %v783_v27 = vld [vmem:[%s1955_s10 + $0x28] sm:$0xff]  ;;  %v781_v29 = vld [vmem:[%s1955_s10 + $0x18] sm:$0xff]  ;;  %s1848_s16 = sshll.u32 %s590_s13, 3  ;;  %s882_s18 = sshll.u32 %s878_s20, 4  ;;  %s883_s18 = int_to_ptr.hbm [resolvable:$true] %s882_s18 }
  0x40   : > { %1114 = vmatmul.msk.f32.vlgmr.msra.gmra.mxu1 %vm650_vm2, %v615_v8  ;;  %707 = vmatpush.msra.mxu2 %v684_v10  ;;  %v744_v24 = vld [vmem:[#allocation7] sm:$0xff]  ;;  %v1244_v30 = vld [vmem:[#allocation2] ss:$0 sm:$0xff]  ;;  %s606_s6 = scalar_lea.vmem [#allocation16], %s1848_s16  ;;  %v780_v36 = vld [vmem:[%s1955_s10 + $0x10] sm:$0xff]  ;;  %s599_s30 = scalar_lea.vmem [#allocation14], %s1848_s16 }
  0x41   : > { %1117 = vmatmul.msk.f32.vlgmr.msra.gmra.mxu3 %vm622_vm1, %v1784_v3  ;;  %771 = vmatpush.msrb.mxu0 %v745_v23  ;;  %v782_v28 = vld [vmem:[%s1955_s10 + $0x20] sm:$0xff]  ;;  %v779_v37 = vld [vmem:[%s1955_s10 + $0x8] sm:$0xff]  ;;  %v1245_v40 = vld [vmem:[#allocation8] ss:$0 sm:$0xff]  ;;  %s880_s23 = sshll.u32 %s599_s30, 4  ;;  %s1877_s25 = sshll.u32 %s606_s6, 4  ;;  %s881_s23 = int_to_ptr.vmem [resolvable:$true] %s880_s23  ;;  %s895_s25 = int_to_ptr.vmem [resolvable:$true] %s1877_s25 }
  0x42   : > { %708 = vmatpush.msra.mxu2 %v683_v11  ;;  %801 = vmatpush.msrb.mxu3 %v785_v25  ;;  %v778_v38 = vld [vmem:[%s1955_s10] sm:$0xff]  ;;  %s1879_s9 = sshll.u32 %s892_s7, 4  ;;  %s849_s17 = scalar_lea.sflag [#allocation15], %s848_s29  ;;  %s897_s9 = int_to_ptr.hbm [resolvable:$true] %s1879_s9 }
  0x43   : > { %772 = vmatpush.msrb.mxu0 %v744_v24  ;;  %v816_v39 = vld [vmem:[#allocation11] sm:$0xf]  ;;  %s1445_s26 = sshra.s32 %s883_s18, 4  ;;  %s1451_s21 = scalar_lea.hbm %s1959_s14, 16  ;;  %s1446_s26 = int_to_ptr.hbm [resolvable:$true] %s1445_s26 }
  0x44   : > { %709 = vmatpush.msra.mxu2 %v682_v12  ;;  %802 = vmatpush.msrb.mxu3 %v784_v26  ;;  %s1447_s22 = scalar_lea.hbm %s1446_s26, 8  ;;  %p1452_p3 = scmp.lt.s32.totalorder %s1446_s26, %s1959_s14 }
  0x45   : > { %1121 = vmatpush.msk.msrb.mxu1 %vm626_vm0, %v816_v39  ;;  %p1448_p0 = scmp.ne.s32.totalorder %s1446_s26, %s1447_s22  ;;  %p1453_p4 = scmp.lt.s32.totalorder %s1451_s21, %s1447_s22 }
  0x46   : > { %710 = vmatpush.msra.mxu2 %v681_v13  ;;  %803 = vmatpush.msrb.mxu3 %v783_v27 }
  0x47   : > { %p1449_p1 = pnand %p1448_p0, %p1699_p5  ;;  %p1454_p7 = por %p1453_p4, %p1452_p3 }
  0x48   : > { %711 = vmatpush.msra.mxu2 %v680_v14  ;;  %804 = vmatpush.msrb.mxu3 %v782_v28 }
  0x49   : > { %1122 = vmatmul.msk.f32.vlgmr.msrb.gmra.mxu1 %vm622_vm1, %v1784_v3  ;;  %p1450_p2 = pneg %p1449_p1 }
  0x4a   : > { %805 = vmatpush.msrb.mxu3 %v781_v29 }
  0x4b   : > { %p1455_p8 = pnand %p1454_p7, %p1450_p2 }
  0x4c   : > { %806 = vmatpush.msrb.mxu3 %v780_v36 }
  0x4e   : > { %807 = vmatpush.msrb.mxu3 %v779_v37 }
  0x50   : > { %808 = vmatpush.msrb.mxu3 %v778_v38 }
  0xbc   : > { %v647_v17 = vpop.f32.mrf.mxu0 }
  0xbd   : > { %v671_v19 = vpop.f32.mrf.mxu1 }
  0xbe   : > { %v672_v20 = vadd.f32 %v671_v19, %v647_v17 }
  0xc0   : > { %v678_v21 = vadd.f32 %v1243_v18, %v672_v20 }
  0xc2   : > { %v679_v22 = vmax.f32 %v678_v21, 0.0 }
  0xc4   : > { %1115 = vmatmul.msk.f32.vlgmr.msra.gmra.mxu2 %vm692_vm3, %v679_v22  ;;  %v738_v33 = vpop.f32.mrf.mxu3 }
  0xc6   : > { %v837_v44 = vpop.f32.mrf.mxu1 }
  0xc7   : > { %v840_v45 = vmul.f32 1.442695, %v837_v44 }
  0xc9   : > { %1247 = vpow2.f32 %v840_v45 }
  0xcf   : > { %v1248_v46 = vpop.eup %1247 }
  0xd0   : > { %842 = vst [vmem:[%s599_s30] sm:$0xff] %v1248_v46 }
 0x147   : > { %v713_v31 = vpop.f32.mrf.mxu2 }
 0x148   : > { %v714_v32 = vadd.f32 %v1244_v30, %v713_v31 }
 0x14a   : > { %v716_v34 = vmax.f32 %v714_v32, 0.0 }
 0x14c   : > { %v741_v35 = vadd.f32 %v738_v33, %v716_v34 }
 0x14e   : > { %743 = vst.msk [vmem:[%s606_s6] sm:$0xff] %vm742_vm4, %v741_v35  ;;  %1119 = vmatmul.msk.f32.vlgmr.msrb.gmra.mxu0 %vm742_vm4, %v741_v35 }
 0x1cb   : > { %v774_v41 = vpop.f32.mrf.mxu0 }
 0x1cc   : > { %v775_v42 = vadd.f32 %v1245_v40, %v774_v41 }
 0x1ce   : > { %v777_v43 = vmax.f32 %v775_v42, 0.0 }
 0x1d0   : > { %1120 = vmatmul.msk.f32.vlgmr.msrb.gmra.mxu3 %vm692_vm3, %v777_v43 }
 0x1d1   : > { %1458 = shalt.err (!%p1455_p8)
}
 0x1d2   : > { %1156 = dma.vmem_to_hbm [thread:$0]  (%p1699_p5), %s881_s23, 128, %s883_s18, %s849_s17  }
 0x1d3   : > { %s1473_s29 = sshra.s32 %s897_s9, 4  ;;  %s1479_s26 = scalar_lea.hbm %s1960_s15, 16  ;;  %s1474_s29 = int_to_ptr.hbm [resolvable:$true] %s1473_s29 }
 0x1d4   : > { %s1475_s30 = scalar_lea.hbm %s1474_s29, 8  ;;  %p1480_p12 = scmp.lt.s32.totalorder %s1474_s29, %s1960_s15 }
 0x1d5   : > { %p1476_p9 = scmp.ne.s32.totalorder %s1474_s29, %s1475_s30  ;;  %p1481_p13 = scmp.lt.s32.totalorder %s1479_s26, %s1475_s30 }
 0x1d7   : > { %p1477_p10 = pnand %p1476_p9, %p1699_p5  ;;  %p1482_p0 = por %p1481_p13, %p1480_p12 }
 0x1d9   : > { %p1478_p11 = pneg %p1477_p10 }
 0x1db   : > { %p1483_p1 = pnand %p1482_p0, %p1478_p11 }
 0x1dd   : > { %1486 = shalt.err (!%p1483_p1)
}
 0x1de   : > { %1157 = dma.vmem_to_hbm [thread:$0]  (%p1699_p5), %s895_s25, 128, %s897_s9, %s849_s17   ;;  %v1246_v47 = vld [vmem:[#allocation10] ss:$0 sm:$0xff] }
 0x1df   : > { %s1987_s27 = sld [smem:[#allocation32_spill]]  ;;  %s592_s29 = scalar_lea.vmem [#allocation13], %s1848_s16 }
 0x1e0   : > { %s866_s30 = sshll.u32 %s592_s29, 4  ;;  %s844_s20 = scalar_lea.sflag [#allocation4], %s590_s13  ;;  %s867_s30 = int_to_ptr.vmem [resolvable:$true] %s866_s30 }
 0x1e5   : > { %s864_s7 = scalar_lea.hbm %s1987_s27, %s1865_s24  ;;  %s1507_s24 = scalar_lea.hbm %s1987_s27, 16 }
 0x1e6   : > { %s868_s6 = sshll.u32 %s864_s7, 4  ;;  %s869_s6 = int_to_ptr.hbm [resolvable:$true] %s868_s6 }
 0x1e7   : > { %s1501_s25 = sshra.s32 %s869_s6, 4  ;;  %s1502_s25 = int_to_ptr.hbm [resolvable:$true] %s1501_s25 }
 0x1e8   : > { %s1503_s9 = scalar_lea.hbm %s1502_s25, 8  ;;  %p1508_p7 = scmp.lt.s32.totalorder %s1502_s25, %s1987_s27 }
 0x1e9   : > { %p1504_p2 = scmp.ne.s32.totalorder %s1502_s25, %s1503_s9  ;;  %p1509_p8 = scmp.lt.s32.totalorder %s1507_s24, %s1503_s9 }
 0x1eb   : > { %p1505_p3 = pnand %p1504_p2, %p1699_p5  ;;  %p1510_p9 = por %p1509_p8, %p1508_p7 }
 0x1ed   : > { %p1506_p4 = pneg %p1505_p3 }
 0x1ef   : > { %p1511_p10 = pnand %p1510_p9, %p1506_p4 }
 0x253   : > { %v810_v48 = vpop.f32.mrf.mxu3 }
 0x254   : > { %v811_v49 = vadd.f32 %v1246_v47, %v810_v48 }
 0x256   : > { %v813_v50 = vmul.f32 1.442695, %v811_v49 }
 0x258   : > { %1249 = vpow2.f32 %v813_v50 }
 0x25e   : > { %v1250_v51 = vpop.eup %1249 }
 0x25f   : > { %815 = vst [vmem:[%s592_s29] sm:$0xff] %v1250_v51 }
 0x260   : > { %1514 = shalt.err (!%p1511_p10)
}
 0x261   : > { %1155 = dma.vmem_to_hbm [thread:$0]  (%p1699_p5), %s867_s30, 128, %s869_s6, %s844_s20  }
 0x262 PF: > { %s1988_s13 = sld [smem:[#allocation25_spill]] }
 0x263   : > { %s1989_s21 = sld [smem:[#allocation23_spill]] }
 0x268   : > { %p1202_p11 = scmp.ge.s32.totalorder %s1988_s13, 2 }
 0x269   : > { %s908_s18 = sand.u32 1, %s1989_s21  }
 0x26a   : > { %p1181_p12 = pnand %p1202_p11, %p1703_p6  ;;  %s909_s7 = scalar_lea.sflag [#allocation4], %s908_s18 }
 0x26c   : > { %p1182_p13 = pneg %p1181_p12 }
 0x26e   : > { %1548 = dma.done.wait (%p1182_p13), %s909_s7, 128  }
 0x26f   : > { %1550 = vsyncadd (%p1182_p13), %s909_s7, 4294967168  ;;  %s1991_s29 = sadd.s32 4294967294, %s1988_s13  }
 0x270   : > { %s918_s25 = sand.u32 1, %s1991_s29  }
 0x271   : > { %s919_s9 = scalar_lea.sflag [#allocation15], %s918_s25 }
 0x272   : > { %1552 = dma.done.wait (%p1182_p13), %s919_s9, 256  }
 0x273   : > { %1554 = vsyncadd (%p1182_p13), %s919_s9, 4294967040  ;;  %s1992_s21 = sld [smem:[#allocation26_spill]]  ;;  %s1995_s18 = smov %s1561_s19 }
 0x274   : > { %s1993_s28 = sld [smem:[#allocation24_spill]] }
 0x275   : > { %s1994_s20 = sld [smem:[#allocation27_spill]] }
 0x279   : > { %p33_p5 = scmp.ge.s32.totalorder %s1992_s21, 4  }
 0x27a   : > { %s1996_s19 = smov %s1993_s28 }
 0x27b   :  { %35 = sbr.rel (!%p33_p5) target bundleno = 14 (0xe), region = 167 }
 0x280   :  { %935 = vsyncpa [#allocation3], 1 }
 0x281   :  { %937 = vsyncpa [#allocation3 + $0x1], 1 }
 0x282   :  { %938 = vsyncpa [#allocation6], 1 }
 0x283   :  { %939 = vsyncpa [#allocation9], 1 }
 0x284   :  { %940 = vsyncpa [#allocation12], 1 }
 0x285   :  { %941 = vsyncpa [#allocation4], 1 }
 0x286   :  { %943 = vsyncpa [#allocation4 + $0x1], 1 }
 0x287   :  { %944 = vsyncpa [#allocation15], 1 }
 0x288   :  { %946 = vsyncpa [#allocation15 + $0x1], 1 }

// kernel: tpu_custom_call.1
= control target key start
LH: loop header
LB: loop body
LE: loop exit
PB: predicated region body
PF: predicated region fallthrough
CT: control target
= control target key end

     0   :  { %s1945_s0 = inlined_call_operand.vmem [shape: f32[16,32], index: 0, kind: input, shape index: {}]   ;;  %s1946_s1 = inlined_call_operand.vmem [shape: f32[16,4], index: 1, kind: input, shape index: {}]   ;;  %s1947_s2 = inlined_call_operand.vmem [shape: f32[32,64], index: 2, kind: input, shape index: {}]   ;;  %s1948_s3 = inlined_call_operand.vmem [shape: f32[4,64], index: 3, kind: input, shape index: {}]   ;;  %s1949_s4 = inlined_call_operand.vmem [shape: f32[1,64], index: 4, kind: input, shape index: {}]   ;;  %s1950_s5 = inlined_call_operand.vmem [shape: f32[64,20], index: 5, kind: input, shape index: {}]   ;;  %s1951_s6 = inlined_call_operand.hbm [shape: f32[1,20], index: 6, kind: input, shape index: {}]   ;;  %s1952_s7 = inlined_call_operand.hbm [shape: f32[4,20], index: 7, kind: input, shape index: {}]   ;;  %s1953_s8 = inlined_call_operand.hbm [shape: f32[20,64], index: 8, kind: input, shape index: {}]   ;;  %s1954_s9 = inlined_call_operand.hbm [shape: f32[1,64], index: 9, kind: input, shape index: {}]   ;;  %s1955_s10 = inlined_call_operand.vmem [shape: f32[64,128], index: 10, kind: input, shape index: {}]   ;;  %s1956_s11 = inlined_call_operand.hbm [shape: f32[1,128], index: 11, kind: input, shape index: {}]   ;;  %s1957_s12 = inlined_call_operand.hbm [shape: f32[4,128], index: 12, kind: input, shape index: {}]   ;;  %s1958_s13 = inlined_call_operand.hbm [shape: f32[16,128], index: 13, kind: output, shape index: {0}]   ;;  %s1959_s14 = inlined_call_operand.hbm [shape: f32[16,128], index: 14, kind: output, shape index: {1}]   ;;  %s1960_s15 = inlined_call_operand.hbm [shape: f32[16,20], index: 15, kind: output, shape index: {2}]  }
   0x1   :  { %1970 = sst [smem:[#allocation29_spill]] %s1951_s6 }
   0x2   :  { %1971 = sst [smem:[#allocation30_spill]] %s1952_s7 }
   0x3   :  { %1972 = sst [smem:[#allocation31_spill]] %s1954_s9 }
   0x4   :  { %1973 = sst [smem:[#allocation32_spill]] %s1958_s13 }
   0x5   :  { %21 = vsyncpa [#allocation3], 0 }
   0x6   :  { %22 = vsyncpa [#allocation6], 0 }
   0x7   :  { %23 = vsyncpa [#allocation9], 0 }
   0x8   :  { %24 = vsyncpa [#allocation12], 0 }
   0x9   :  { %25 = vsyncpa [#allocation4], 0 }
   0xa   :  { %27 = vsyncpa [#allocation4 + $0x1], 0 }
   0xb   :  { %28 = vsyncpa [#allocation15], 0 }
   0xc   :  { %30 = vsyncpa [#allocation15 + $0x1], 0  ;;  %s1659_s18 = smov 0   ;;  %s1661_s19 = smov 0  }
   0xd   :  { %s1663_s20 = smov 0   ;;  %s1665_s21 = smov 0  }
   0xe LB: > { %1974 = sst [smem:[#allocation23_spill]] %s1557_s18  ;;  %s1680_s22 = sadd.s32 4294967295, %s1569_s21   ;;  %s1569_s21 = sphi %s1665_s21, %s1992_s21   ;;  %s1565_s20 = sphi %s1663_s20, %s1994_s20   ;;  %s1561_s19 = sphi %s1661_s19, %s1996_s19   ;;  %s1557_s18 = sphi %s1659_s18, %s1995_s18  }
   0xf   : > { %1975 = sst [smem:[#allocation24_spill]] %s1565_s20  ;;  %s1961_s23 = sadd.s32 4294967294, %s1569_s21  }
  0x10   : > { %1976 = sst [smem:[#allocation25_spill]] %s1569_s21  ;;  %s1684_s24 = sadd.s32 1, %s1569_s21  }
  0x11   : > { %1977 = sst [smem:[#allocation26_spill]] %s1684_s24  ;;  %s326_s25 = sadd.s32 1, %s1565_s20 }
  0x12   : > { %s323_s26 = ssub.s32 %s1569_s21, %s1684_s24  ;;  %p336_p0 = scmp.ne.s32.totalorder %s1565_s20, %s1561_s19 }
  0x13   : > { %p324_p1 = scmp.eq.s32.totalorder %s323_s26, 0  ;;  %p337_p2 = scmp.eq.s32.totalorder %s1680_s22, 1 }
  0x14   : > { %p342_p3 = scmp.ne.s32.totalorder %s1561_s19, %s1557_s18  ;;  %p343_p4 = scmp.eq.s32.totalorder %s1961_s23, 1 }
  0x15   : > { %s1697_s27 = scalar_select %p324_p1, %s1565_s20, %s326_s25  }
  0x16   : > { %p1699_p5 = por %p337_p2, %p336_p0  ;;  %p1703_p6 = por %p343_p4, %p342_p3 }
  0x17   : > { %1978 = sst [smem:[#allocation27_spill]] %s1697_s27  ;;  %p1092_p7 = scmp.ge.s32.totalorder %s1569_s21, 1 }
  0x18   : > { %s1980_s29 = scalar_select %p1703_p6, 1, 0 }
  0x19   : > { %p402_p8 = scmp.lt.s32.totalorder %s1569_s21, 3  ;;  %p1190_p9 = scmp.eq.s32.totalorder %s1680_s22, 0 }
  0x1a   : > { %1981 = sst [smem:[#allocation28_spill]] %s1980_s29  ;;  %s1571_s26 = smov [#allocation5]  }
  0x1b   : > { %p1710_p10 = pnand %p1092_p7, %p402_p8  ;;  %s1983_s7 = sld [smem:[#allocation30_spill]] }
  0x1c   : > { %s440_s23 = sshll.u32 %s1571_s26, 4  ;;  %s1984_s9 = sld [smem:[#allocation31_spill]]  ;;  %s441_s23 = int_to_ptr.vmem [resolvable:$true] %s440_s23 }
  0x1d   : > { %p1161_p11 = pneg %p1710_p10  ;;  %s1986_s6 = sld [smem:[#allocation29_spill]] }
  0x1e   : > { %s1572_s18 = smov [#allocation8]   ;;  %s1573_s21 = smov [#allocation2]  }
  0x1f   : > { %p1724_p12 = pnand %p1190_p9, %p1161_p11  ;;  %s466_s26 = sshll.u32 %s1572_s18, 4  ;;  %s467_s26 = int_to_ptr.vmem [resolvable:$true] %s466_s26 }
  0x20   : > { %s428_s13 = sshll.u32 %s1573_s21, 4  ;;  %s1574_s16 = smov [#allocation7]   ;;  %s429_s13 = int_to_ptr.vmem [resolvable:$true] %s428_s13 }
  0x21   : > { %s438_s25 = sshll.u32 %s1983_s7, 4  ;;  %s451_s18 = sshll.u32 %s1574_s16, 4  ;;  %s439_s25 = int_to_ptr.hbm [resolvable:$true] %s438_s25  ;;  %s452_s18 = int_to_ptr.vmem [resolvable:$true] %s451_s18 }
  0x22   : > { %s464_s24 = sshll.u32 %s1984_s9, 4  ;;  %s449_s9 = sshll.u32 %s1953_s8, 4  ;;  %s465_s24 = int_to_ptr.hbm [resolvable:$true] %s464_s24  ;;  %s450_s9 = int_to_ptr.hbm [resolvable:$true] %s449_s9 }
  0x23   : > { %s426_s7 = sshll.u32 %s1986_s6, 4  ;;  %s1577_s20 = smov [#allocation10]   ;;  %s427_s7 = int_to_ptr.hbm [resolvable:$true] %s426_s7 }
  0x24   : > { %1167 = dma.hbm_to_vmem [thread:$0]  (!%p1724_p12), %s439_s25, 64, %s441_s23, [#allocation6]  }
  0x25   : > { %1173 = dma.hbm_to_vmem [thread:$0]  (!%p1724_p12), %s465_s24, 16, %s467_s26, [#allocation9]  }
  0x26   : > { %1164 = dma.hbm_to_vmem [thread:$0]  (!%p1724_p12), %s427_s7, 16, %s429_s13, [#allocation3]  }
  0x27   : > { %s1575_s23 = smov 128   ;;  %s1576_s25 = smov 8  }
  0x28   : > { %1170 = dma.hbm_to_vmem [thread:$0]  (!%p1724_p12), %s450_s9, 384, %s452_s18, [#allocation6], %s1575_s23, %s1575_s23, %s1576_s25  }
  0x29   : > { %s479_s26 = sshll.u32 %s1956_s11, 4  ;;  %s481_s21 = sshll.u32 %s1577_s20, 4  ;;  %s480_s26 = int_to_ptr.hbm [resolvable:$true] %s479_s26  ;;  %s482_s21 = int_to_ptr.vmem [resolvable:$true] %s481_s21 }
  0x2a   : > { %s491_s7 = sshll.u32 %s1957_s12, 4  ;;  %s1578_s13 = smov [#allocation11]   ;;  %s492_s7 = int_to_ptr.hbm [resolvable:$true] %s491_s7 }
  0x2b   : > { %1176 = dma.hbm_to_vmem [thread:$0]  (!%p1724_p12), %s480_s26, 16, %s482_s21, [#allocation9]  }
  0x2c   : > { %s493_s16 = sshll.u32 %s1578_s13, 4  ;;  %520 = sbr.rel (%p1710_p10) target bundleno = 610 (0x262), region = 72  ;;  %s494_s16 = int_to_ptr.vmem [resolvable:$true] %s493_s16 }
  0x2d   : > { %1179 = dma.hbm_to_vmem [thread:$0]  (!%p1724_p12), %s492_s7, 64, %s494_s16, [#allocation12]  }
  0x31   : > { %1532 = dma.done.wait (%p1190_p9), [#allocation3], 16  }
  0x32   : > { %1534 = vsyncadd (%p1190_p9), [#allocation3], 4294967280 }
  0x33   : > { %1536 = dma.done.wait (%p1190_p9), [#allocation6], 448  }
  0x34   : > { %1538 = vsyncadd (%p1190_p9), [#allocation6], 4294966848 }
  0x35   : > { %1540 = dma.done.wait (%p1190_p9), [#allocation9], 32  }
  0x36   : > { %1542 = vsyncadd (%p1190_p9), [#allocation9], 4294967264 }
  0x37   : > { %1544 = dma.done.wait (%p1190_p9), [#allocation12], 64  }
  0x38   : > { %1546 = vsyncadd (%p1190_p9), [#allocation12], 4294967232  ;;  %p607_p13 = scmp.lt.s32.totalorder %s1680_s22, 1  ;;  %vm626_vm0 = vcmask 1043456   ;;  %v620_v0 = vld [vmem:[%s1947_s2 + $0x18] sm:$0xff]  ;;  %v619_v1 = vld [vmem:[%s1947_s2 + $0x10] sm:$0xff] }
  0x39   : > { %vm622_vm1 = vcmask 31744   ;;  %666 = vmatpush.msra.mxu1 %v620_v0  ;;  %v621_v2 = vld [vmem:[%s1948_s3] sm:$0xf]  ;;  %v618_v4 = vld [vmem:[%s1947_s2 + $0x8] sm:$0xff]  ;;  %v687_v5 = vld [vmem:[%s1950_s5 + $0x38] sm:$0xff]  ;;  %vm650_vm2 = vcmask 261120  }
  0x3a   : > { %s608_s6 = scalar_select %p607_p13, %s1680_s22, 1  ;;  %1112 = vmatpush.msk.msra.mxu0 %vm626_vm0, %v621_v2  ;;  %v617_v6 = vld [vmem:[%s1947_s2] sm:$0xff]  ;;  %v686_v7 = vld [vmem:[%s1950_s5 + $0x30] sm:$0xff]  ;;  %704 = vmatpush.msra.mxu2 %v687_v5  ;;  %v685_v9 = vld [vmem:[%s1950_s5 + $0x28] sm:$0xff]  ;;  %vm692_vm3 = vcmask 523264   ;;  %vm742_vm4 = vcmask 162816  }
  0x3b   : > { %667 = vmatpush.msra.mxu1 %v619_v1  ;;  %v684_v10 = vld [vmem:[%s1950_s5 + $0x20] sm:$0xff]  ;;  %v683_v11 = vld [vmem:[%s1950_s5 + $0x18] sm:$0xff]  ;;  %v682_v12 = vld [vmem:[%s1950_s5 + $0x10] sm:$0xff]  ;;  %s590_s13 = sand.u32 1, %s1561_s19   ;;  %s1865_s24 = sshll.u32 %s1680_s22, 3 }
  0x3c   : > { %s1110_s9 = sshll.u32 %s608_s6, 3  ;;  %705 = vmatpush.msra.mxu2 %v686_v7  ;;  %v681_v13 = vld [vmem:[%s1950_s5 + $0x8] sm:$0xff]  ;;  %v680_v14 = vld [vmem:[%s1950_s5] sm:$0xff]  ;;  %v746_v16 = vld [vmem:[#allocation7 + $0x10] sm:$0xf]  ;;  %s878_s20 = scalar_lea.hbm %s1959_s14, %s1865_s24 }
  0x3d   : > { %s614_s18 = scalar_lea.vmem %s1946_s1, %s1110_s9  ;;  %s610_s16 = scalar_lea.vmem %s1945_s0, %s1110_s9  ;;  %668 = vmatpush.msra.mxu1 %v618_v4  ;;  %v717_v15 = vld [vmem:[#allocation5] sm:$0xf]  ;;  %1118 = vmatpush.msk.msrb.mxu0 %vm626_vm0, %v746_v16  ;;  %v1243_v18 = vld [vmem:[%s1949_s4] ss:$0 sm:$0xff]  ;;  %v745_v23 = vld [vmem:[#allocation7 + $0x8] sm:$0xff] }
  0x3e   : > { %v1784_v3 = vld [vmem:[%s614_s18] sm:$0xff]  ;;  %706 = vmatpush.msra.mxu2 %v685_v9  ;;  %1116 = vmatpush.msk.msra.mxu3 %vm626_vm0, %v717_v15  ;;  %v785_v25 = vld [vmem:[%s1955_s10 + $0x38] sm:$0xff]  ;;  %v784_v26 = vld [vmem:[%s1955_s10 + $0x30] sm:$0xff]  ;;  %s892_s7 = scalar_lea.hbm %s1960_s15, %s1865_s24  ;;  %s848_s29 = sand.u32 1, %s1680_s22  }
  0x3f   : > { %1113 = vmatmul.msk.f32.vlgmr.msra.gmra.mxu0 %vm622_vm1, %v1784_v3  ;;  %v615_v8 = vld [vmem:[%s610_s16] sm:$0xff]  ;;  %669 = vmatpush.msra.mxu1 %v617_v6  ;;  %v783_v27 = vld [vmem:[%s1955_s10 + $0x28] sm:$0xff]  ;;  %v781_v29 = vld [vmem:[%s1955_s10 + $0x18] sm:$0xff]  ;;  %s1848_s16 = sshll.u32 %s590_s13, 3  ;;  %s882_s18 = sshll.u32 %s878_s20, 4  ;;  %s883_s18 = int_to_ptr.hbm [resolvable:$true] %s882_s18 }
  0x40   : > { %1114 = vmatmul.msk.f32.vlgmr.msra.gmra.mxu1 %vm650_vm2, %v615_v8  ;;  %707 = vmatpush.msra.mxu2 %v684_v10  ;;  %v744_v24 = vld [vmem:[#allocation7] sm:$0xff]  ;;  %v1244_v30 = vld [vmem:[#allocation2] ss:$0 sm:$0xff]  ;;  %s606_s6 = scalar_lea.vmem [#allocation16], %s1848_s16  ;;  %v780_v36 = vld [vmem:[%s1955_s10 + $0x10] sm:$0xff]  ;;  %s599_s30 = scalar_lea.vmem [#allocation14], %s1848_s16 }
  0x41   : > { %1117 = vmatmul.msk.f32.vlgmr.msra.gmra.mxu3 %vm622_vm1, %v1784_v3  ;;  %771 = vmatpush.msrb.mxu0 %v745_v23  ;;  %v782_v28 = vld [vmem:[%s1955_s10 + $0x20] sm:$0xff]  ;;  %v779_v37 = vld [vmem:[%s1955_s10 + $0x8] sm:$0xff]  ;;  %v1245_v40 = vld [vmem:[#allocation8] ss:$0 sm:$0xff]  ;;  %s880_s23 = sshll.u32 %s599_s30, 4  ;;  %s1877_s25 = sshll.u32 %s606_s6, 4  ;;  %s881_s23 = int_to_ptr.vmem [resolvable:$true] %s880_s23  ;;  %s895_s25 = int_to_ptr.vmem [resolvable:$true] %s1877_s25 }
  0x42   : > { %708 = vmatpush.msra.mxu2 %v683_v11  ;;  %801 = vmatpush.msrb.mxu3 %v785_v25  ;;  %v778_v38 = vld [vmem:[%s1955_s10] sm:$0xff]  ;;  %s1879_s9 = sshll.u32 %s892_s7, 4  ;;  %s849_s17 = scalar_lea.sflag [#allocation15], %s848_s29  ;;  %s897_s9 = int_to_ptr.hbm [resolvable:$true] %s1879_s9 }
  0x43   : > { %772 = vmatpush.msrb.mxu0 %v744_v24  ;;  %v816_v39 = vld [vmem:[#allocation11] sm:$0xf]  ;;  %s1445_s26 = sshra.s32 %s883_s18, 4  ;;  %s1451_s21 = scalar_lea.hbm %s1959_s14, 16  ;;  %s1446_s26 = int_to_ptr.hbm [resolvable:$true] %s1445_s26 }
  0x44   : > { %709 = vmatpush.msra.mxu2 %v682_v12  ;;  %802 = vmatpush.msrb.mxu3 %v784_v26  ;;  %s1447_s22 = scalar_lea.hbm %s1446_s26, 8  ;;  %p1452_p3 = scmp.lt.s32.totalorder %s1446_s26, %s1959_s14 }
  0x45   : > { %1121 = vmatpush.msk.msrb.mxu1 %vm626_vm0, %v816_v39  ;;  %p1448_p0 = scmp.ne.s32.totalorder %s1446_s26, %s1447_s22  ;;  %p1453_p4 = scmp.lt.s32.totalorder %s1451_s21, %s1447_s22 }
  0x46   : > { %710 = vmatpush.msra.mxu2 %v681_v13  ;;  %803 = vmatpush.msrb.mxu3 %v783_v27 }
  0x47   : > { %p1449_p1 = pnand %p1448_p0, %p1699_p5  ;;  %p1454_p7 = por %p1453_p4, %p1452_p3 }
  0x48   : > { %711 = vmatpush.msra.mxu2 %v680_v14  ;;  %804 = vmatpush.msrb.mxu3 %v782_v28 }
  0x49   : > { %1122 = vmatmul.msk.f32.vlgmr.msrb.gmra.mxu1 %vm622_vm1, %v1784_v3  ;;  %p1450_p2 = pneg %p1449_p1 }
  0x4a   : > { %805 = vmatpush.msrb.mxu3 %v781_v29 }
  0x4b   : > { %p1455_p8 = pnand %p1454_p7, %p1450_p2 }
  0x4c   : > { %806 = vmatpush.msrb.mxu3 %v780_v36 }
  0x4e   : > { %807 = vmatpush.msrb.mxu3 %v779_v37 }
  0x50   : > { %808 = vmatpush.msrb.mxu3 %v778_v38 }
  0xbc   : > { %v647_v17 = vpop.f32.mrf.mxu0 }
  0xbd   : > { %v671_v19 = vpop.f32.mrf.mxu1 }
  0xbe   : > { %v672_v20 = vadd.f32 %v671_v19, %v647_v17 }
  0xc0   : > { %v678_v21 = vadd.f32 %v1243_v18, %v672_v20 }
  0xc2   : > { %v679_v22 = vmax.f32 %v678_v21, 0.0 }
  0xc4   : > { %1115 = vmatmul.msk.f32.vlgmr.msra.gmra.mxu2 %vm692_vm3, %v679_v22  ;;  %v738_v33 = vpop.f32.mrf.mxu3 }
  0xc6   : > { %v837_v44 = vpop.f32.mrf.mxu1 }
  0xc7   : > { %v840_v45 = vmul.f32 1.442695, %v837_v44 }
  0xc9   : > { %1247 = vpow2.f32 %v840_v45 }
  0xcf   : > { %v1248_v46 = vpop.eup %1247 }
  0xd0   : > { %842 = vst [vmem:[%s599_s30] sm:$0xff] %v1248_v46 }
 0x147   : > { %v713_v31 = vpop.f32.mrf.mxu2 }
 0x148   : > { %v714_v32 = vadd.f32 %v1244_v30, %v713_v31 }
 0x14a   : > { %v716_v34 = vmax.f32 %v714_v32, 0.0 }
 0x14c   : > { %v741_v35 = vadd.f32 %v738_v33, %v716_v34 }
 0x14e   : > { %743 = vst.msk [vmem:[%s606_s6] sm:$0xff] %vm742_vm4, %v741_v35  ;;  %1119 = vmatmul.msk.f32.vlgmr.msrb.gmra.mxu0 %vm742_vm4, %v741_v35 }
 0x1cb   : > { %v774_v41 = vpop.f32.mrf.mxu0 }
 0x1cc   : > { %v775_v42 = vadd.f32 %v1245_v40, %v774_v41 }
 0x1ce   : > { %v777_v43 = vmax.f32 %v775_v42, 0.0 }
 0x1d0   : > { %1120 = vmatmul.msk.f32.vlgmr.msrb.gmra.mxu3 %vm692_vm3, %v777_v43 }
 0x1d1   : > { %1458 = shalt.err (!%p1455_p8)
}
 0x1d2   : > { %1156 = dma.vmem_to_hbm [thread:$0]  (%p1699_p5), %s881_s23, 128, %s883_s18, %s849_s17  }
 0x1d3   : > { %s1473_s29 = sshra.s32 %s897_s9, 4  ;;  %s1479_s26 = scalar_lea.hbm %s1960_s15, 16  ;;  %s1474_s29 = int_to_ptr.hbm [resolvable:$true] %s1473_s29 }
 0x1d4   : > { %s1475_s30 = scalar_lea.hbm %s1474_s29, 8  ;;  %p1480_p12 = scmp.lt.s32.totalorder %s1474_s29, %s1960_s15 }
 0x1d5   : > { %p1476_p9 = scmp.ne.s32.totalorder %s1474_s29, %s1475_s30  ;;  %p1481_p13 = scmp.lt.s32.totalorder %s1479_s26, %s1475_s30 }
 0x1d7   : > { %p1477_p10 = pnand %p1476_p9, %p1699_p5  ;;  %p1482_p0 = por %p1481_p13, %p1480_p12 }
 0x1d9   : > { %p1478_p11 = pneg %p1477_p10 }
 0x1db   : > { %p1483_p1 = pnand %p1482_p0, %p1478_p11 }
 0x1dd   : > { %1486 = shalt.err (!%p1483_p1)
}
 0x1de   : > { %1157 = dma.vmem_to_hbm [thread:$0]  (%p1699_p5), %s895_s25, 128, %s897_s9, %s849_s17   ;;  %v1246_v47 = vld [vmem:[#allocation10] ss:$0 sm:$0xff] }
 0x1df   : > { %s1987_s27 = sld [smem:[#allocation32_spill]]  ;;  %s592_s29 = scalar_lea.vmem [#allocation13], %s1848_s16 }
 0x1e0   : > { %s866_s30 = sshll.u32 %s592_s29, 4  ;;  %s844_s20 = scalar_lea.sflag [#allocation4], %s590_s13  ;;  %s867_s30 = int_to_ptr.vmem [resolvable:$true] %s866_s30 }
 0x1e5   : > { %s864_s7 = scalar_lea.hbm %s1987_s27, %s1865_s24  ;;  %s1507_s24 = scalar_lea.hbm %s1987_s27, 16 }
 0x1e6   : > { %s868_s6 = sshll.u32 %s864_s7, 4  ;;  %s869_s6 = int_to_ptr.hbm [resolvable:$true] %s868_s6 }
 0x1e7   : > { %s1501_s25 = sshra.s32 %s869_s6, 4  ;;  %s1502_s25 = int_to_ptr.hbm [resolvable:$true] %s1501_s25 }
 0x1e8   : > { %s1503_s9 = scalar_lea.hbm %s1502_s25, 8  ;;  %p1508_p7 = scmp.lt.s32.totalorder %s1502_s25, %s1987_s27 }
 0x1e9   : > { %p1504_p2 = scmp.ne.s32.totalorder %s1502_s25, %s1503_s9  ;;  %p1509_p8 = scmp.lt.s32.totalorder %s1507_s24, %s1503_s9 }
 0x1eb   : > { %p1505_p3 = pnand %p1504_p2, %p1699_p5  ;;  %p1510_p9 = por %p1509_p8, %p1508_p7 }
 0x1ed   : > { %p1506_p4 = pneg %p1505_p3 }
 0x1ef   : > { %p1511_p10 = pnand %p1510_p9, %p1506_p4 }
 0x253   : > { %v810_v48 = vpop.f32.mrf.mxu3 }
 0x254   : > { %v811_v49 = vadd.f32 %v1246_v47, %v810_v48 }
 0x256   : > { %v813_v50 = vmul.f32 1.442695, %v811_v49 }
 0x258   : > { %1249 = vpow2.f32 %v813_v50 }
 0x25e   : > { %v1250_v51 = vpop.eup %1249 }
 0x25f   : > { %815 = vst [vmem:[%s592_s29] sm:$0xff] %v1250_v51 }
 0x260   : > { %1514 = shalt.err (!%p1511_p10)
}
 0x261   : > { %1155 = dma.vmem_to_hbm [thread:$0]  (%p1699_p5), %s867_s30, 128, %s869_s6, %s844_s20  }
 0x262 PF: > { %s1988_s13 = sld [smem:[#allocation25_spill]] }
 0x263   : > { %s1989_s21 = sld [smem:[#allocation23_spill]] }
 0x268   : > { %p1202_p11 = scmp.ge.s32.totalorder %s1988_s13, 2 }
 0x269   : > { %s908_s18 = sand.u32 1, %s1989_s21  }
 0x26a   : > { %p1181_p12 = pnand %p1202_p11, %p1703_p6  ;;  %s909_s7 = scalar_lea.sflag [#allocation4], %s908_s18 }
 0x26c   : > { %p1182_p13 = pneg %p1181_p12 }
 0x26e   : > { %1548 = dma.done.wait (%p1182_p13), %s909_s7, 128  }
 0x26f   : > { %1550 = vsyncadd (%p1182_p13), %s909_s7, 4294967168  ;;  %s1991_s29 = sadd.s32 4294967294, %s1988_s13  }
 0x270   : > { %s918_s25 = sand.u32 1, %s1991_s29  }
 0x271   : > { %s919_s9 = scalar_lea.sflag [#allocation15], %s918_s25 }
 0x272   : > { %1552 = dma.done.wait (%p1182_p13), %s919_s9, 256  }
 0x273   : > { %1554 = vsyncadd (%p1182_p13), %s919_s9, 4294967040  ;;  %s1992_s21 = sld [smem:[#allocation26_spill]]  ;;  %s1995_s18 = smov %s1561_s19 }
 0x274   : > { %s1993_s28 = sld [smem:[#allocation24_spill]] }
 0x275   : > { %s1994_s20 = sld [smem:[#allocation27_spill]] }
 0x279   : > { %p33_p5 = scmp.ge.s32.totalorder %s1992_s21, 4  }
 0x27a   : > { %s1996_s19 = smov %s1993_s28 }
 0x27b   :  { %35 = sbr.rel (!%p33_p5) target bundleno = 14 (0xe), region = 167 }
 0x280   :  { %935 = vsyncpa [#allocation3], 1 }
 0x281   :  { %937 = vsyncpa [#allocation3 + $0x1], 1 }
 0x282   :  { %938 = vsyncpa [#allocation6], 1 }
 0x283   :  { %939 = vsyncpa [#allocation9], 1 }
 0x284   :  { %940 = vsyncpa [#allocation12], 1 }
 0x285   :  { %941 = vsyncpa [#allocation4], 1 }
 0x286   :  { %943 = vsyncpa [#allocation4 + $0x1], 1 }
 0x287   :  { %944 = vsyncpa [#allocation15], 1 }
 0x288   :  { %946 = vsyncpa [#allocation15 + $0x1], 1 }

</bundles_post_ra>
